<compile_context>
chip_gen: v7x
topology: tpu7x:2x2x1
jax: 0.10.0
libtpu: 0.0.40
codegen_flags: <defaults>
</compile_context>

<pallas_src>
import functools

import jax
import jax.numpy as jnp
from jax.experimental import pallas as pl
from jax.experimental.pallas import tpu as pltpu


def _round_up(x, m):
    return (x + m - 1) // m * m


def movie_encoder_kernel(mid_ref, cats_ref, memb_ref, cemb_ref, w_ref, b_ref,
                         vec_ref, comb_ref, *, tb, bag_len, cnt_lane,
                         bias_out_lane):
    """One batch tile of `tb` rows (tb % 8 == 0).

    mid_ref  : SMEM [B_pad]          int32  (scalar prefetch) movie ids
    cats_ref : SMEM [B_pad*L]        int32  (scalar prefetch) flattened bags
    memb_ref : VMEM [NM, F_pad]      f32    lane 0 = movie bias, 1..1+MED = emb
    cemb_ref : VMEM [NC, F_pad]      f32    1+MED..1+MED+MCD = cat emb,
                                            lane cnt_lane = 1.0 marker (row 0 = all zeros)
    w_ref    : VMEM [F_pad, CED_pad] f32    bias / count lanes map to zero rows
    b_ref    : VMEM [1, CED_pad]     f32
    vec_ref  : VMEM [tb, CED_pad]    f32    lanes [0,CED) = fc output, lane CED = movie bias
    comb_ref : VMEM [tb, F_pad]      f32    scratch: gathered + bag-mean rows
    """
    base = pl.program_id(0) * tb
    n_groups = tb // 8

    def group_body(g, carry):
        r0 = pl.multiple_of(g * 8, 8)
        mrows, crows = [], []
        for r in range(8):                       # static 8-row group: gathers co-issue
            idx = base + r0 + r
            m = mid_ref[idx]
            mrows.append(memb_ref[pl.ds(m, 1), :])            # [1, F_pad] emb + bias lane
            csum = jnp.zeros_like(mrows[-1])
            for l in range(bag_len):
                c = cats_ref[idx * bag_len + l]
                csum = csum + cemb_ref[pl.ds(c, 1), :]        # row 0 is all-zero (padding_idx)
            crows.append(csum)
        mblk = jnp.concatenate(mrows, axis=0)                 # [8, F_pad]
        cblk = jnp.concatenate(crows, axis=0)                 # [8, F_pad]
        # Bag mean: per-row valid count was accumulated in the marker lane.
        cnt = cblk[:, cnt_lane:cnt_lane + 1]                  # [8, 1]
        inv = pl.reciprocal(jnp.maximum(cnt, 1.0), approx=False)
        # One aligned full-vreg [8, F_pad] store per group (no masked 1-row stores).
        comb_ref[pl.ds(r0, 8), :] = mblk + cblk * inv
        return carry

    jax.lax.fori_loop(0, n_groups, group_body, 0,
                      unroll=True if n_groups <= 8 else 8)

    combined = comb_ref[...]                                  # [tb, F_pad]
    bias_col = combined[:, 0:1]                               # pre-ReLU movie bias (exact)
    h = jnp.maximum(combined, 0.0)                            # ReLU; Dropout(eval) = identity
    # Single fused lane-dense K=F_pad matmul (movie + category parts together).
    out = jnp.dot(h, w_ref[...], preferred_element_type=jnp.float32) + b_ref[...]
    # Fold the bias into the spare padded output lane -> single lane-dense output.
    lane = jax.lax.broadcasted_iota(jnp.int32, out.shape, 1)
    vec_ref[...] = jnp.where(lane == bias_out_lane, bias_col, out)


def prepare_params(params):
    """One-time parameter prep: fused bias lane, count-marker lane, lane padding, W^T."""
    memb = jnp.asarray(params["emb_movies"], jnp.float32)        # [NM, MED]
    cemb = jnp.asarray(params["emb_movie_cats"], jnp.float32)    # [NC, MCD]
    mbias = jnp.asarray(params["bias_movie"], jnp.float32)       # [NM, 1]
    fc_w = jnp.asarray(params["fc_w"], jnp.float32)              # [CED, MED+MCD]
    fc_b = jnp.asarray(params["fc_b"], jnp.float32)              # [CED]

    NM, MED = memb.shape
    NC, MCD = cemb.shape
    CED = fc_w.shape[0]
    F = MED + MCD
    cnt_lane = 1 + F                       # [bias | movie emb | cat emb | count marker]
    F_pad = _round_up(cnt_lane + 1, 128)
    CED_pad = _round_up(CED + 1, 128)      # +1 lane carries the movie bias in vec output

    # EmbeddingBag(padding_idx=0): index 0 is excluded from the mean. Zero its row so
    # the numerator is handled by the gather itself; the marker lane gives the count.
    cemb = cemb.at[0].set(0.0)

    memb_fused = jnp.zeros((NM, F_pad), jnp.float32)
    memb_fused = memb_fused.at[:, 0:1].set(mbias)
    memb_fused = memb_fused.at[:, 1:1 + MED].set(memb)

    cemb_pad = jnp.zeros((NC, F_pad), jnp.float32)
    cemb_pad = cemb_pad.at[:, 1 + MED:1 + F].set(cemb)
    cemb_pad = cemb_pad.at[1:, cnt_lane].set(1.0)    # count marker; padding row stays 0

    # TODO(synk): bf16 tables would halve VMEM residency (key for v7x / big vocabs);
    # kept f32 so the fused movie-bias lane keeps full precision at tight tolerances.
    w_pad = jnp.zeros((F_pad, CED_pad), jnp.float32)
    w_pad = w_pad.at[1:1 + F, :CED].set(fc_w.T)      # bias / count lanes hit zero rows

    b_pad = jnp.zeros((1, CED_pad), jnp.float32)
    b_pad = b_pad.at[0, :CED].set(fc_b)

    return {"memb_fused": memb_fused, "cemb_pad": cemb_pad, "w_pad": w_pad,
            "b_pad": b_pad, "CED": CED, "cnt_lane": cnt_lane,
            "num_movies": NM, "num_categories": NC}


def movie_encoder(movie_id, movie_categories, prep):
    """movie_id: [B] int, movie_categories: [B, L] int -> (vec [B,CED], bias [B])."""
    memb_fused = prep["memb_fused"]
    cemb_pad = prep["cemb_pad"]
    w_pad = prep["w_pad"]
    b_pad = prep["b_pad"]
    CED = prep["CED"]
    cnt_lane = prep["cnt_lane"]

    B = movie_id.shape[0]
    L = movie_categories.shape[1]
    F_pad = memb_fused.shape[1]
    CED_pad = w_pad.shape[1]
    bias_out_lane = CED

    # Batch tile: multiple of 8 sublanes, aim for >=2 grid steps (v7x has 2 TCs and
    # the batch axis is "parallel"), cap at 512 rows to amortize per-step overhead on
    # v5e/v6e. TB > 64 is rounded to a multiple of 64 so the in-kernel 8-row group
    # loop unrolls evenly by 8.
    TB = min(512, max(8, _round_up(-(-B // 2), 8)))
    if TB > 64:
        TB = _round_up(TB, 64)
    B_pad = _round_up(B, TB)

    # Clamp ids so out-of-range inputs can't trigger unchecked dynamic VMEM reads.
    mid = jnp.clip(movie_id.astype(jnp.int32), 0, prep["num_movies"] - 1)
    cats = jnp.clip(movie_categories.astype(jnp.int32), 0, prep["num_categories"] - 1)
    mid = jnp.zeros((B_pad,), jnp.int32).at[:B].set(mid)
    cats_p = jnp.zeros((B_pad, L), jnp.int32).at[:B, :].set(cats)
    cats_flat = cats_p.reshape(B_pad * L)        # 1-D keeps SMEM pow2 padding small
    # TODO(synk): for production batch sizes, tile the id arrays per grid step instead
    # of scalar-prefetching the whole batch (SMEM usage here is O(B*L)).

    kernel = functools.partial(movie_encoder_kernel, tb=TB, bag_len=L,
                               cnt_lane=cnt_lane, bias_out_lane=bias_out_lane)

    try:
        vmem_cap = int(pltpu.get_tpu_info().vmem_capacity_bytes)
    except Exception:
        vmem_cap = 64 << 20                      # conservative (v7x per-TC)

    def build(single_buffer_tables):
        spec_kw = {"pipeline_mode": pl.Buffered(1)} if single_buffer_tables else {}

        def resident(shape):                     # full table, constant block -> fetched once
            return pl.BlockSpec(shape, lambda *_: (0, 0), **spec_kw)

        table_bytes = int(memb_fused.size + cemb_pad.size + w_pad.size + b_pad.size) * 4
        table_bytes *= 1 if single_buffer_tables else 2
        vmem_need = table_bytes + 2 * TB * CED_pad * 4 + TB * F_pad * 4 + (8 << 20)
        vmem_limit = int(min(max(vmem_need, 16 << 20), vmem_cap - (8 << 20)))
        # TODO(synk): movie tables too big for VMEM (large vocab on v7x) need the
        # HBM-resident + per-row DMA-gather variant instead of VMEM residency.

        return pl.pallas_call(
            kernel,
            out_shape=jax.ShapeDtypeStruct((B_pad, CED_pad), jnp.float32),
            grid_spec=pltpu.PrefetchScalarGridSpec(
                num_scalar_prefetch=2,           # mid, cats_flat -> SMEM
                grid=(B_pad // TB,),
                in_specs=[resident(memb_fused.shape),
                          resident(cemb_pad.shape),
                          resident(w_pad.shape),
                          resident(b_pad.shape)],
                out_specs=pl.BlockSpec((TB, CED_pad), lambda i, *_: (i, 0)),
                scratch_shapes=[pltpu.VMEM((TB, F_pad), jnp.float32)]),
            compiler_params=pltpu.CompilerParams(
                dimension_semantics=("parallel",),
                vmem_limit_bytes=vmem_limit),
        )

    args = (mid, cats_flat, memb_fused, cemb_pad, w_pad, b_pad)
    try:
        vec_pad = build(True)(*args)
        jax.block_until_ready(vec_pad)
    except Exception:
        # pipeline_mode=pl.Buffered(1) rejected by this JAX build: fall back to the
        # default (double-buffered) resident-table specs.
        vec_pad = build(False)(*args)

    return vec_pad[:B, :CED], vec_pad[:B, bias_out_lane]


def _reference(movie_id, movie_categories, params):
    """Pure-JAX reference of the PyTorch forward (eval mode)."""
    memb, cemb, mbias, fc_w, fc_b = (params["emb_movies"], params["emb_movie_cats"],
                                     params["bias_movie"], params["fc_w"], params["fc_b"])
    raw = memb[movie_id]                                           # [B, MED]
    mask = (movie_categories != 0).astype(jnp.float32)             # [B, L]
    gathered = cemb[movie_categories] * mask[..., None]            # [B, L, MCD]
    denom = jnp.maximum(mask.sum(axis=1, keepdims=True), 1.0)
    cat_vec = gathered.sum(axis=1) / denom                         # [B, MCD]
    mv = jnp.concatenate([raw, cat_vec], axis=1)
    mv = jnp.maximum(mv, 0.0)                                      # relu; dropout(eval)=id
    vec = mv @ fc_w.T + fc_b
    bias = mbias[movie_id].reshape(-1)
    return vec, bias


if __name__ == "__main__":
    # Small, deterministic synthetic setup.
    num_movies, movie_embedding_dim = 64, 32
    num_categories, movie_category_dim = 16, 16
    common_embedding_dim = 32
    B, L = 8, 6

    key = jax.random.PRNGKey(0)
    k = jax.random.split(key, 8)
    params = {
        "emb_movies": jax.random.normal(k[0], (num_movies, movie_embedding_dim), jnp.float32),
        "emb_movie_cats": jax.random.normal(k[1], (num_categories, movie_category_dim),
                                            jnp.float32).at[0].set(0.0),  # padding_idx row = 0
        "bias_movie": jax.random.normal(k[2], (num_movies, 1), jnp.float32),
        "fc_w": jax.random.normal(
            k[3], (common_embedding_dim, movie_embedding_dim + movie_category_dim),
            jnp.float32) * 0.1,
        "fc_b": jax.random.normal(k[4], (common_embedding_dim,), jnp.float32) * 0.1,
    }
    # TODO(synk): training-mode dropout (random mask) not implemented; eval-mode identity used.

    prep = prepare_params(params)                # one-time table fusion / padding

    movie_id = jax.random.randint(k[5], (B,), 0, num_movies, jnp.int32)
    movie_categories = jax.random.randint(k[6], (B, L), 0, num_categories, jnp.int32)
    movie_categories = movie_categories.at[0, 3:].set(0)   # exercise padding_idx exclusion
    movie_categories = movie_categories.at[1, :].set(0)    # fully-padded bag -> zeros

    vec, bias = movie_encoder(movie_id, movie_categories, prep)
    jax.block_until_ready((vec, bias))

    ref_vec, ref_bias = _reference(movie_id, movie_categories, params)
    assert vec.shape == (B, common_embedding_dim) and bias.shape == (B,)
    assert jnp.allclose(vec, ref_vec, atol=1e-4, rtol=1e-4)
    assert jnp.allclose(bias, ref_bias, atol=1e-5, rtol=1e-5)
    print("KERNEL_OK")
</pallas_src>

<mosaic_0001>
module attributes {stable_mosaic.version = 11 : i64} {
  func.func @movie_encoder_kernel(%arg0: i32, %arg1: memref<8xi32, #tpu.memory_space<smem>>, %arg2: memref<48xi32, #tpu.memory_space<smem>>, %arg3: memref<64x128xf32, #tpu.memory_space<vmem>>, %arg4: memref<16x128xf32, #tpu.memory_space<vmem>>, %arg5: memref<128x128xf32, #tpu.memory_space<vmem>>, %arg6: memref<1x128xf32, #tpu.memory_space<vmem>>, %arg7: memref<8x128xf32, #tpu.memory_space<vmem>>, %arg8: memref<8x128xf32, #tpu.memory_space<vmem>>) attributes {dimension_semantics = [#tpu.dimension_semantics<parallel>], iteration_bounds = array<i64: 1>, scalar_prefetch = 2 : i64, scratch_operands = 1 : i64, tpu.core_type = #tpu.core_type<tc>, window_params = [{pipeline_mode = #tpu.pipeline_mode<synchronous>, transform_indices = @transform_0, window_bounds = array<i64: 64, 128>}, {pipeline_mode = #tpu.pipeline_mode<synchronous>, transform_indices = @transform_1, window_bounds = array<i64: 16, 128>}, {pipeline_mode = #tpu.pipeline_mode<synchronous>, transform_indices = @transform_2, window_bounds = array<i64: 128, 128>}, {pipeline_mode = #tpu.pipeline_mode<synchronous>, transform_indices = @transform_3, window_bounds = array<i64: 1, 128>}, {transform_indices = @transform_4, window_bounds = array<i64: 8, 128>}]} {
    %c8_i32 = arith.constant 8 : i32
    %0 = arith.muli %arg0, %c8_i32 : i32
    %c0_i32 = arith.constant 0 : i32
    %c8_i32_0 = arith.constant 8 : i32
    %1 = arith.muli %c0_i32, %c8_i32_0 : i32
    %2 = tpu.assume_multiple %1, 8 : i32
    %3 = arith.addi %0, %2 : i32
    %c0_i32_1 = arith.constant 0 : i32
    %4 = arith.addi %3, %c0_i32_1 : i32
    %5 = arith.index_cast %4 : i32 to index
    %6 = memref.load %arg1[%5] : memref<8xi32, #tpu.memory_space<smem>>
    %7 = arith.index_cast %6 : i32 to index
    %c0 = arith.constant 0 : index
    %8 = vector.load %arg3[%7, %c0] : memref<64x128xf32, #tpu.memory_space<vmem>>, vector<1x128xf32>
    %cst = arith.constant 0.000000e+00 : f32
    %9 = vector.broadcast %cst : f32 to vector<1x128xf32>
    %c6_i32 = arith.constant 6 : i32
    %10 = arith.muli %4, %c6_i32 : i32
    %c0_i32_2 = arith.constant 0 : i32
    %11 = arith.addi %10, %c0_i32_2 : i32
    %12 = arith.index_cast %11 : i32 to index
    %13 = memref.load %arg2[%12] : memref<48xi32, #tpu.memory_space<smem>>
    %14 = arith.index_cast %13 : i32 to index
    %c0_3 = arith.constant 0 : index
    %15 = vector.load %arg4[%14, %c0_3] : memref<16x128xf32, #tpu.memory_space<vmem>>, vector<1x128xf32>
    %16 = arith.addf %9, %15 : vector<1x128xf32>
    %c6_i32_4 = arith.constant 6 : i32
    %17 = arith.muli %4, %c6_i32_4 : i32
    %c1_i32 = arith.constant 1 : i32
    %18 = arith.addi %17, %c1_i32 : i32
    %19 = arith.index_cast %18 : i32 to index
    %20 = memref.load %arg2[%19] : memref<48xi32, #tpu.memory_space<smem>>
    %21 = arith.index_cast %20 : i32 to index
    %c0_5 = arith.constant 0 : index
    %22 = vector.load %arg4[%21, %c0_5] : memref<16x128xf32, #tpu.memory_space<vmem>>, vector<1x128xf32>
    %23 = arith.addf %16, %22 : vector<1x128xf32>
    %c6_i32_6 = arith.constant 6 : i32
    %24 = arith.muli %4, %c6_i32_6 : i32
    %c2_i32 = arith.constant 2 : i32
    %25 = arith.addi %24, %c2_i32 : i32
    %26 = arith.index_cast %25 : i32 to index
    %27 = memref.load %arg2[%26] : memref<48xi32, #tpu.memory_space<smem>>
    %28 = arith.index_cast %27 : i32 to index
    %c0_7 = arith.constant 0 : index
    %29 = vector.load %arg4[%28, %c0_7] : memref<16x128xf32, #tpu.memory_space<vmem>>, vector<1x128xf32>
    %30 = arith.addf %23, %29 : vector<1x128xf32>
    %c6_i32_8 = arith.constant 6 : i32
    %31 = arith.muli %4, %c6_i32_8 : i32
    %c3_i32 = arith.constant 3 : i32
    %32 = arith.addi %31, %c3_i32 : i32
    %33 = arith.index_cast %32 : i32 to index
    %34 = memref.load %arg2[%33] : memref<48xi32, #tpu.memory_space<smem>>
    %35 = arith.index_cast %34 : i32 to index
    %c0_9 = arith.constant 0 : index
    %36 = vector.load %arg4[%35, %c0_9] : memref<16x128xf32, #tpu.memory_space<vmem>>, vector<1x128xf32>
    %37 = arith.addf %30, %36 : vector<1x128xf32>
    %c6_i32_10 = arith.constant 6 : i32
    %38 = arith.muli %4, %c6_i32_10 : i32
    %c4_i32 = arith.constant 4 : i32
    %39 = arith.addi %38, %c4_i32 : i32
    %40 = arith.index_cast %39 : i32 to index
    %41 = memref.load %arg2[%40] : memref<48xi32, #tpu.memory_space<smem>>
    %42 = arith.index_cast %41 : i32 to index
    %c0_11 = arith.constant 0 : index
    %43 = vector.load %arg4[%42, %c0_11] : memref<16x128xf32, #tpu.memory_space<vmem>>, vector<1x128xf32>
    %44 = arith.addf %37, %43 : vector<1x128xf32>
    %c6_i32_12 = arith.constant 6 : i32
    %45 = arith.muli %4, %c6_i32_12 : i32
    %c5_i32 = arith.constant 5 : i32
    %46 = arith.addi %45, %c5_i32 : i32
    %47 = arith.index_cast %46 : i32 to index
    %48 = memref.load %arg2[%47] : memref<48xi32, #tpu.memory_space<smem>>
    %49 = arith.index_cast %48 : i32 to index
    %c0_13 = arith.constant 0 : index
    %50 = vector.load %arg4[%49, %c0_13] : memref<16x128xf32, #tpu.memory_space<vmem>>, vector<1x128xf32>
    %51 = arith.addf %44, %50 : vector<1x128xf32>
    %52 = arith.addi %0, %2 : i32
    %c1_i32_14 = arith.constant 1 : i32
    %53 = arith.addi %52, %c1_i32_14 : i32
    %54 = arith.index_cast %53 : i32 to index
    %55 = memref.load %arg1[%54] : memref<8xi32, #tpu.memory_space<smem>>
    %56 = arith.index_cast %55 : i32 to index
    %c0_15 = arith.constant 0 : index
    %57 = vector.load %arg3[%56, %c0_15] : memref<64x128xf32, #tpu.memory_space<vmem>>, vector<1x128xf32>
    %cst_16 = arith.constant 0.000000e+00 : f32
    %58 = vector.broadcast %cst_16 : f32 to vector<1x128xf32>
    %c6_i32_17 = arith.constant 6 : i32
    %59 = arith.muli %53, %c6_i32_17 : i32
    %c0_i32_18 = arith.constant 0 : i32
    %60 = arith.addi %59, %c0_i32_18 : i32
    %61 = arith.index_cast %60 : i32 to index
    %62 = memref.load %arg2[%61] : memref<48xi32, #tpu.memory_space<smem>>
    %63 = arith.index_cast %62 : i32 to index
    %c0_19 = arith.constant 0 : index
    %64 = vector.load %arg4[%63, %c0_19] : memref<16x128xf32, #tpu.memory_space<vmem>>, vector<1x128xf32>
    %65 = arith.addf %58, %64 : vector<1x128xf32>
    %c6_i32_20 = arith.constant 6 : i32
    %66 = arith.muli %53, %c6_i32_20 : i32
    %c1_i32_21 = arith.constant 1 : i32
    %67 = arith.addi %66, %c1_i32_21 : i32
    %68 = arith.index_cast %67 : i32 to index
    %69 = memref.load %arg2[%68] : memref<48xi32, #tpu.memory_space<smem>>
    %70 = arith.index_cast %69 : i32 to index
    %c0_22 = arith.constant 0 : index
    %71 = vector.load %arg4[%70, %c0_22] : memref<16x128xf32, #tpu.memory_space<vmem>>, vector<1x128xf32>
    %72 = arith.addf %65, %71 : vector<1x128xf32>
    %c6_i32_23 = arith.constant 6 : i32
    %73 = arith.muli %53, %c6_i32_23 : i32
    %c2_i32_24 = arith.constant 2 : i32
    %74 = arith.addi %73, %c2_i32_24 : i32
    %75 = arith.index_cast %74 : i32 to index
    %76 = memref.load %arg2[%75] : memref<48xi32, #tpu.memory_space<smem>>
    %77 = arith.index_cast %76 : i32 to index
    %c0_25 = arith.constant 0 : index
    %78 = vector.load %arg4[%77, %c0_25] : memref<16x128xf32, #tpu.memory_space<vmem>>, vector<1x128xf32>
    %79 = arith.addf %72, %78 : vector<1x128xf32>
    %c6_i32_26 = arith.constant 6 : i32
    %80 = arith.muli %53, %c6_i32_26 : i32
    %c3_i32_27 = arith.constant 3 : i32
    %81 = arith.addi %80, %c3_i32_27 : i32
    %82 = arith.index_cast %81 : i32 to index
    %83 = memref.load %arg2[%82] : memref<48xi32, #tpu.memory_space<smem>>
    %84 = arith.index_cast %83 : i32 to index
    %c0_28 = arith.constant 0 : index
    %85 = vector.load %arg4[%84, %c0_28] : memref<16x128xf32, #tpu.memory_space<vmem>>, vector<1x128xf32>
    %86 = arith.addf %79, %85 : vector<1x128xf32>
    %c6_i32_29 = arith.constant 6 : i32
    %87 = arith.muli %53, %c6_i32_29 : i32
    %c4_i32_30 = arith.constant 4 : i32
    %88 = arith.addi %87, %c4_i32_30 : i32
    %89 = arith.index_cast %88 : i32 to index
    %90 = memref.load %arg2[%89] : memref<48xi32, #tpu.memory_space<smem>>
    %91 = arith.index_cast %90 : i32 to index
    %c0_31 = arith.constant 0 : index
    %92 = vector.load %arg4[%91, %c0_31] : memref<16x128xf32, #tpu.memory_space<vmem>>, vector<1x128xf32>
    %93 = arith.addf %86, %92 : vector<1x128xf32>
    %c6_i32_32 = arith.constant 6 : i32
    %94 = arith.muli %53, %c6_i32_32 : i32
    %c5_i32_33 = arith.constant 5 : i32
    %95 = arith.addi %94, %c5_i32_33 : i32
    %96 = arith.index_cast %95 : i32 to index
    %97 = memref.load %arg2[%96] : memref<48xi32, #tpu.memory_space<smem>>
    %98 = arith.index_cast %97 : i32 to index
    %c0_34 = arith.constant 0 : index
    %99 = vector.load %arg4[%98, %c0_34] : memref<16x128xf32, #tpu.memory_space<vmem>>, vector<1x128xf32>
    %100 = arith.addf %93, %99 : vector<1x128xf32>
    %101 = arith.addi %0, %2 : i32
    %c2_i32_35 = arith.constant 2 : i32
    %102 = arith.addi %101, %c2_i32_35 : i32
    %103 = arith.index_cast %102 : i32 to index
    %104 = memref.load %arg1[%103] : memref<8xi32, #tpu.memory_space<smem>>
    %105 = arith.index_cast %104 : i32 to index
    %c0_36 = arith.constant 0 : index
    %106 = vector.load %arg3[%105, %c0_36] : memref<64x128xf32, #tpu.memory_space<vmem>>, vector<1x128xf32>
    %cst_37 = arith.constant 0.000000e+00 : f32
    %107 = vector.broadcast %cst_37 : f32 to vector<1x128xf32>
    %c6_i32_38 = arith.constant 6 : i32
    %108 = arith.muli %102, %c6_i32_38 : i32
    %c0_i32_39 = arith.constant 0 : i32
    %109 = arith.addi %108, %c0_i32_39 : i32
    %110 = arith.index_cast %109 : i32 to index
    %111 = memref.load %arg2[%110] : memref<48xi32, #tpu.memory_space<smem>>
    %112 = arith.index_cast %111 : i32 to index
    %c0_40 = arith.constant 0 : index
    %113 = vector.load %arg4[%112, %c0_40] : memref<16x128xf32, #tpu.memory_space<vmem>>, vector<1x128xf32>
    %114 = arith.addf %107, %113 : vector<1x128xf32>
    %c6_i32_41 = arith.constant 6 : i32
    %115 = arith.muli %102, %c6_i32_41 : i32
    %c1_i32_42 = arith.constant 1 : i32
    %116 = arith.addi %115, %c1_i32_42 : i32
    %117 = arith.index_cast %116 : i32 to index
    %118 = memref.load %arg2[%117] : memref<48xi32, #tpu.memory_space<smem>>
    %119 = arith.index_cast %118 : i32 to index
    %c0_43 = arith.constant 0 : index
    %120 = vector.load %arg4[%119, %c0_43] : memref<16x128xf32, #tpu.memory_space<vmem>>, vector<1x128xf32>
    %121 = arith.addf %114, %120 : vector<1x128xf32>
    %c6_i32_44 = arith.constant 6 : i32
    %122 = arith.muli %102, %c6_i32_44 : i32
    %c2_i32_45 = arith.constant 2 : i32
    %123 = arith.addi %122, %c2_i32_45 : i32
    %124 = arith.index_cast %123 : i32 to index
    %125 = memref.load %arg2[%124] : memref<48xi32, #tpu.memory_space<smem>>
    %126 = arith.index_cast %125 : i32 to index
    %c0_46 = arith.constant 0 : index
    %127 = vector.load %arg4[%126, %c0_46] : memref<16x128xf32, #tpu.memory_space<vmem>>, vector<1x128xf32>
    %128 = arith.addf %121, %127 : vector<1x128xf32>
    %c6_i32_47 = arith.constant 6 : i32
    %129 = arith.muli %102, %c6_i32_47 : i32
    %c3_i32_48 = arith.constant 3 : i32
    %130 = arith.addi %129, %c3_i32_48 : i32
    %131 = arith.index_cast %130 : i32 to index
    %132 = memref.load %arg2[%131] : memref<48xi32, #tpu.memory_space<smem>>
    %133 = arith.index_cast %132 : i32 to index
    %c0_49 = arith.constant 0 : index
    %134 = vector.load %arg4[%133, %c0_49] : memref<16x128xf32, #tpu.memory_space<vmem>>, vector<1x128xf32>
    %135 = arith.addf %128, %134 : vector<1x128xf32>
    %c6_i32_50 = arith.constant 6 : i32
    %136 = arith.muli %102, %c6_i32_50 : i32
    %c4_i32_51 = arith.constant 4 : i32
    %137 = arith.addi %136, %c4_i32_51 : i32
    %138 = arith.index_cast %137 : i32 to index
    %139 = memref.load %arg2[%138] : memref<48xi32, #tpu.memory_space<smem>>
    %140 = arith.index_cast %139 : i32 to index
    %c0_52 = arith.constant 0 : index
    %141 = vector.load %arg4[%140, %c0_52] : memref<16x128xf32, #tpu.memory_space<vmem>>, vector<1x128xf32>
    %142 = arith.addf %135, %141 : vector<1x128xf32>
    %c6_i32_53 = arith.constant 6 : i32
    %143 = arith.muli %102, %c6_i32_53 : i32
    %c5_i32_54 = arith.constant 5 : i32
    %144 = arith.addi %143, %c5_i32_54 : i32
    %145 = arith.index_cast %144 : i32 to index
    %146 = memref.load %arg2[%145] : memref<48xi32, #tpu.memory_space<smem>>
    %147 = arith.index_cast %146 : i32 to index
    %c0_55 = arith.constant 0 : index
    %148 = vector.load %arg4[%147, %c0_55] : memref<16x128xf32, #tpu.memory_space<vmem>>, vector<1x128xf32>
    %149 = arith.addf %142, %148 : vector<1x128xf32>
    %150 = arith.addi %0, %2 : i32
    %c3_i32_56 = arith.constant 3 : i32
    %151 = arith.addi %150, %c3_i32_56 : i32
    %152 = arith.index_cast %151 : i32 to index
    %153 = memref.load %arg1[%152] : memref<8xi32, #tpu.memory_space<smem>>
    %154 = arith.index_cast %153 : i32 to index
    %c0_57 = arith.constant 0 : index
    %155 = vector.load %arg3[%154, %c0_57] : memref<64x128xf32, #tpu.memory_space<vmem>>, vector<1x128xf32>
    %cst_58 = arith.constant 0.000000e+00 : f32
    %156 = vector.broadcast %cst_58 : f32 to vector<1x128xf32>
    %c6_i32_59 = arith.constant 6 : i32
    %157 = arith.muli %151, %c6_i32_59 : i32
    %c0_i32_60 = arith.constant 0 : i32
    %158 = arith.addi %157, %c0_i32_60 : i32
    %159 = arith.index_cast %158 : i32 to index
    %160 = memref.load %arg2[%159] : memref<48xi32, #tpu.memory_space<smem>>
    %161 = arith.index_cast %160 : i32 to index
    %c0_61 = arith.constant 0 : index
    %162 = vector.load %arg4[%161, %c0_61] : memref<16x128xf32, #tpu.memory_space<vmem>>, vector<1x128xf32>
    %163 = arith.addf %156, %162 : vector<1x128xf32>
    %c6_i32_62 = arith.constant 6 : i32
    %164 = arith.muli %151, %c6_i32_62 : i32
    %c1_i32_63 = arith.constant 1 : i32
    %165 = arith.addi %164, %c1_i32_63 : i32
    %166 = arith.index_cast %165 : i32 to index
    %167 = memref.load %arg2[%166] : memref<48xi32, #tpu.memory_space<smem>>
    %168 = arith.index_cast %167 : i32 to index
    %c0_64 = arith.constant 0 : index
    %169 = vector.load %arg4[%168, %c0_64] : memref<16x128xf32, #tpu.memory_space<vmem>>, vector<1x128xf32>
    %170 = arith.addf %163, %169 : vector<1x128xf32>
    %c6_i32_65 = arith.constant 6 : i32
    %171 = arith.muli %151, %c6_i32_65 : i32
    %c2_i32_66 = arith.constant 2 : i32
    %172 = arith.addi %171, %c2_i32_66 : i32
    %173 = arith.index_cast %172 : i32 to index
    %174 = memref.load %arg2[%173] : memref<48xi32, #tpu.memory_space<smem>>
    %175 = arith.index_cast %174 : i32 to index
    %c0_67 = arith.constant 0 : index
    %176 = vector.load %arg4[%175, %c0_67] : memref<16x128xf32, #tpu.memory_space<vmem>>, vector<1x128xf32>
    %177 = arith.addf %170, %176 : vector<1x128xf32>
    %c6_i32_68 = arith.constant 6 : i32
    %178 = arith.muli %151, %c6_i32_68 : i32
    %c3_i32_69 = arith.constant 3 : i32
    %179 = arith.addi %178, %c3_i32_69 : i32
    %180 = arith.index_cast %179 : i32 to index
    %181 = memref.load %arg2[%180] : memref<48xi32, #tpu.memory_space<smem>>
    %182 = arith.index_cast %181 : i32 to index
    %c0_70 = arith.constant 0 : index
    %183 = vector.load %arg4[%182, %c0_70] : memref<16x128xf32, #tpu.memory_space<vmem>>, vector<1x128xf32>
    %184 = arith.addf %177, %183 : vector<1x128xf32>
    %c6_i32_71 = arith.constant 6 : i32
    %185 = arith.muli %151, %c6_i32_71 : i32
    %c4_i32_72 = arith.constant 4 : i32
    %186 = arith.addi %185, %c4_i32_72 : i32
    %187 = arith.index_cast %186 : i32 to index
    %188 = memref.load %arg2[%187] : memref<48xi32, #tpu.memory_space<smem>>
    %189 = arith.index_cast %188 : i32 to index
    %c0_73 = arith.constant 0 : index
    %190 = vector.load %arg4[%189, %c0_73] : memref<16x128xf32, #tpu.memory_space<vmem>>, vector<1x128xf32>
    %191 = arith.addf %184, %190 : vector<1x128xf32>
    %c6_i32_74 = arith.constant 6 : i32
    %192 = arith.muli %151, %c6_i32_74 : i32
    %c5_i32_75 = arith.constant 5 : i32
    %193 = arith.addi %192, %c5_i32_75 : i32
    %194 = arith.index_cast %193 : i32 to index
    %195 = memref.load %arg2[%194] : memref<48xi32, #tpu.memory_space<smem>>
    %196 = arith.index_cast %195 : i32 to index
    %c0_76 = arith.constant 0 : index
    %197 = vector.load %arg4[%196, %c0_76] : memref<16x128xf32, #tpu.memory_space<vmem>>, vector<1x128xf32>
    %198 = arith.addf %191, %197 : vector<1x128xf32>
    %199 = arith.addi %0, %2 : i32
    %c4_i32_77 = arith.constant 4 : i32
    %200 = arith.addi %199, %c4_i32_77 : i32
    %201 = arith.index_cast %200 : i32 to index
    %202 = memref.load %arg1[%201] : memref<8xi32, #tpu.memory_space<smem>>
    %203 = arith.index_cast %202 : i32 to index
    %c0_78 = arith.constant 0 : index
    %204 = vector.load %arg3[%203, %c0_78] : memref<64x128xf32, #tpu.memory_space<vmem>>, vector<1x128xf32>
    %cst_79 = arith.constant 0.000000e+00 : f32
    %205 = vector.broadcast %cst_79 : f32 to vector<1x128xf32>
    %c6_i32_80 = arith.constant 6 : i32
    %206 = arith.muli %200, %c6_i32_80 : i32
    %c0_i32_81 = arith.constant 0 : i32
    %207 = arith.addi %206, %c0_i32_81 : i32
    %208 = arith.index_cast %207 : i32 to index
    %209 = memref.load %arg2[%208] : memref<48xi32, #tpu.memory_space<smem>>
    %210 = arith.index_cast %209 : i32 to index
    %c0_82 = arith.constant 0 : index
    %211 = vector.load %arg4[%210, %c0_82] : memref<16x128xf32, #tpu.memory_space<vmem>>, vector<1x128xf32>
    %212 = arith.addf %205, %211 : vector<1x128xf32>
    %c6_i32_83 = arith.constant 6 : i32
    %213 = arith.muli %200, %c6_i32_83 : i32
    %c1_i32_84 = arith.constant 1 : i32
    %214 = arith.addi %213, %c1_i32_84 : i32
    %215 = arith.index_cast %214 : i32 to index
    %216 = memref.load %arg2[%215] : memref<48xi32, #tpu.memory_space<smem>>
    %217 = arith.index_cast %216 : i32 to index
    %c0_85 = arith.constant 0 : index
    %218 = vector.load %arg4[%217, %c0_85] : memref<16x128xf32, #tpu.memory_space<vmem>>, vector<1x128xf32>
    %219 = arith.addf %212, %218 : vector<1x128xf32>
    %c6_i32_86 = arith.constant 6 : i32
    %220 = arith.muli %200, %c6_i32_86 : i32
    %c2_i32_87 = arith.constant 2 : i32
    %221 = arith.addi %220, %c2_i32_87 : i32
    %222 = arith.index_cast %221 : i32 to index
    %223 = memref.load %arg2[%222] : memref<48xi32, #tpu.memory_space<smem>>
    %224 = arith.index_cast %223 : i32 to index
    %c0_88 = arith.constant 0 : index
    %225 = vector.load %arg4[%224, %c0_88] : memref<16x128xf32, #tpu.memory_space<vmem>>, vector<1x128xf32>
    %226 = arith.addf %219, %225 : vector<1x128xf32>
    %c6_i32_89 = arith.constant 6 : i32
    %227 = arith.muli %200, %c6_i32_89 : i32
    %c3_i32_90 = arith.constant 3 : i32
    %228 = arith.addi %227, %c3_i32_90 : i32
    %229 = arith.index_cast %228 : i32 to index
    %230 = memref.load %arg2[%229] : memref<48xi32, #tpu.memory_space<smem>>
    %231 = arith.index_cast %230 : i32 to index
    %c0_91 = arith.constant 0 : index
    %232 = vector.load %arg4[%231, %c0_91] : memref<16x128xf32, #tpu.memory_space<vmem>>, vector<1x128xf32>
    %233 = arith.addf %226, %232 : vector<1x128xf32>
    %c6_i32_92 = arith.constant 6 : i32
    %234 = arith.muli %200, %c6_i32_92 : i32
    %c4_i32_93 = arith.constant 4 : i32
    %235 = arith.addi %234, %c4_i32_93 : i32
    %236 = arith.index_cast %235 : i32 to index
    %237 = memref.load %arg2[%236] : memref<48xi32, #tpu.memory_space<smem>>
    %238 = arith.index_cast %237 : i32 to index
    %c0_94 = arith.constant 0 : index
    %239 = vector.load %arg4[%238, %c0_94] : memref<16x128xf32, #tpu.memory_space<vmem>>, vector<1x128xf32>
    %240 = arith.addf %233, %239 : vector<1x128xf32>
    %c6_i32_95 = arith.constant 6 : i32
    %241 = arith.muli %200, %c6_i32_95 : i32
    %c5_i32_96 = arith.constant 5 : i32
    %242 = arith.addi %241, %c5_i32_96 : i32
    %243 = arith.index_cast %242 : i32 to index
    %244 = memref.load %arg2[%243] : memref<48xi32, #tpu.memory_space<smem>>
    %245 = arith.index_cast %244 : i32 to index
    %c0_97 = arith.constant 0 : index
    %246 = vector.load %arg4[%245, %c0_97] : memref<16x128xf32, #tpu.memory_space<vmem>>, vector<1x128xf32>
    %247 = arith.addf %240, %246 : vector<1x128xf32>
    %248 = arith.addi %0, %2 : i32
    %c5_i32_98 = arith.constant 5 : i32
    %249 = arith.addi %248, %c5_i32_98 : i32
    %250 = arith.index_cast %249 : i32 to index
    %251 = memref.load %arg1[%250] : memref<8xi32, #tpu.memory_space<smem>>
    %252 = arith.index_cast %251 : i32 to index
    %c0_99 = arith.constant 0 : index
    %253 = vector.load %arg3[%252, %c0_99] : memref<64x128xf32, #tpu.memory_space<vmem>>, vector<1x128xf32>
    %cst_100 = arith.constant 0.000000e+00 : f32
    %254 = vector.broadcast %cst_100 : f32 to vector<1x128xf32>
    %c6_i32_101 = arith.constant 6 : i32
    %255 = arith.muli %249, %c6_i32_101 : i32
    %c0_i32_102 = arith.constant 0 : i32
    %256 = arith.addi %255, %c0_i32_102 : i32
    %257 = arith.index_cast %256 : i32 to index
    %258 = memref.load %arg2[%257] : memref<48xi32, #tpu.memory_space<smem>>
    %259 = arith.index_cast %258 : i32 to index
    %c0_103 = arith.constant 0 : index
    %260 = vector.load %arg4[%259, %c0_103] : memref<16x128xf32, #tpu.memory_space<vmem>>, vector<1x128xf32>
    %261 = arith.addf %254, %260 : vector<1x128xf32>
    %c6_i32_104 = arith.constant 6 : i32
    %262 = arith.muli %249, %c6_i32_104 : i32
    %c1_i32_105 = arith.constant 1 : i32
    %263 = arith.addi %262, %c1_i32_105 : i32
    %264 = arith.index_cast %263 : i32 to index
    %265 = memref.load %arg2[%264] : memref<48xi32, #tpu.memory_space<smem>>
    %266 = arith.index_cast %265 : i32 to index
    %c0_106 = arith.constant 0 : index
    %267 = vector.load %arg4[%266, %c0_106] : memref<16x128xf32, #tpu.memory_space<vmem>>, vector<1x128xf32>
    %268 = arith.addf %261, %267 : vector<1x128xf32>
    %c6_i32_107 = arith.constant 6 : i32
    %269 = arith.muli %249, %c6_i32_107 : i32
    %c2_i32_108 = arith.constant 2 : i32
    %270 = arith.addi %269, %c2_i32_108 : i32
    %271 = arith.index_cast %270 : i32 to index
    %272 = memref.load %arg2[%271] : memref<48xi32, #tpu.memory_space<smem>>
    %273 = arith.index_cast %272 : i32 to index
    %c0_109 = arith.constant 0 : index
    %274 = vector.load %arg4[%273, %c0_109] : memref<16x128xf32, #tpu.memory_space<vmem>>, vector<1x128xf32>
    %275 = arith.addf %268, %274 : vector<1x128xf32>
    %c6_i32_110 = arith.constant 6 : i32
    %276 = arith.muli %249, %c6_i32_110 : i32
    %c3_i32_111 = arith.constant 3 : i32
    %277 = arith.addi %276, %c3_i32_111 : i32
    %278 = arith.index_cast %277 : i32 to index
    %279 = memref.load %arg2[%278] : memref<48xi32, #tpu.memory_space<smem>>
    %280 = arith.index_cast %279 : i32 to index
    %c0_112 = arith.constant 0 : index
    %281 = vector.load %arg4[%280, %c0_112] : memref<16x128xf32, #tpu.memory_space<vmem>>, vector<1x128xf32>
    %282 = arith.addf %275, %281 : vector<1x128xf32>
    %c6_i32_113 = arith.constant 6 : i32
    %283 = arith.muli %249, %c6_i32_113 : i32
    %c4_i32_114 = arith.constant 4 : i32
    %284 = arith.addi %283, %c4_i32_114 : i32
    %285 = arith.index_cast %284 : i32 to index
    %286 = memref.load %arg2[%285] : memref<48xi32, #tpu.memory_space<smem>>
    %287 = arith.index_cast %286 : i32 to index
    %c0_115 = arith.constant 0 : index
    %288 = vector.load %arg4[%287, %c0_115] : memref<16x128xf32, #tpu.memory_space<vmem>>, vector<1x128xf32>
    %289 = arith.addf %282, %288 : vector<1x128xf32>
    %c6_i32_116 = arith.constant 6 : i32
    %290 = arith.muli %249, %c6_i32_116 : i32
    %c5_i32_117 = arith.constant 5 : i32
    %291 = arith.addi %290, %c5_i32_117 : i32
    %292 = arith.index_cast %291 : i32 to index
    %293 = memref.load %arg2[%292] : memref<48xi32, #tpu.memory_space<smem>>
    %294 = arith.index_cast %293 : i32 to index
    %c0_118 = arith.constant 0 : index
    %295 = vector.load %arg4[%294, %c0_118] : memref<16x128xf32, #tpu.memory_space<vmem>>, vector<1x128xf32>
    %296 = arith.addf %289, %295 : vector<1x128xf32>
    %297 = arith.addi %0, %2 : i32
    %c6_i32_119 = arith.constant 6 : i32
    %298 = arith.addi %297, %c6_i32_119 : i32
    %299 = arith.index_cast %298 : i32 to index
    %300 = memref.load %arg1[%299] : memref<8xi32, #tpu.memory_space<smem>>
    %301 = arith.index_cast %300 : i32 to index
    %c0_120 = arith.constant 0 : index
    %302 = vector.load %arg3[%301, %c0_120] : memref<64x128xf32, #tpu.memory_space<vmem>>, vector<1x128xf32>
    %cst_121 = arith.constant 0.000000e+00 : f32
    %303 = vector.broadcast %cst_121 : f32 to vector<1x128xf32>
    %c6_i32_122 = arith.constant 6 : i32
    %304 = arith.muli %298, %c6_i32_122 : i32
    %c0_i32_123 = arith.constant 0 : i32
    %305 = arith.addi %304, %c0_i32_123 : i32
    %306 = arith.index_cast %305 : i32 to index
    %307 = memref.load %arg2[%306] : memref<48xi32, #tpu.memory_space<smem>>
    %308 = arith.index_cast %307 : i32 to index
    %c0_124 = arith.constant 0 : index
    %309 = vector.load %arg4[%308, %c0_124] : memref<16x128xf32, #tpu.memory_space<vmem>>, vector<1x128xf32>
    %310 = arith.addf %303, %309 : vector<1x128xf32>
    %c6_i32_125 = arith.constant 6 : i32
    %311 = arith.muli %298, %c6_i32_125 : i32
    %c1_i32_126 = arith.constant 1 : i32
    %312 = arith.addi %311, %c1_i32_126 : i32
    %313 = arith.index_cast %312 : i32 to index
    %314 = memref.load %arg2[%313] : memref<48xi32, #tpu.memory_space<smem>>
    %315 = arith.index_cast %314 : i32 to index
    %c0_127 = arith.constant 0 : index
    %316 = vector.load %arg4[%315, %c0_127] : memref<16x128xf32, #tpu.memory_space<vmem>>, vector<1x128xf32>
    %317 = arith.addf %310, %316 : vector<1x128xf32>
    %c6_i32_128 = arith.constant 6 : i32
    %318 = arith.muli %298, %c6_i32_128 : i32
    %c2_i32_129 = arith.constant 2 : i32
    %319 = arith.addi %318, %c2_i32_129 : i32
    %320 = arith.index_cast %319 : i32 to index
    %321 = memref.load %arg2[%320] : memref<48xi32, #tpu.memory_space<smem>>
    %322 = arith.index_cast %321 : i32 to index
    %c0_130 = arith.constant 0 : index
    %323 = vector.load %arg4[%322, %c0_130] : memref<16x128xf32, #tpu.memory_space<vmem>>, vector<1x128xf32>
    %324 = arith.addf %317, %323 : vector<1x128xf32>
    %c6_i32_131 = arith.constant 6 : i32
    %325 = arith.muli %298, %c6_i32_131 : i32
    %c3_i32_132 = arith.constant 3 : i32
    %326 = arith.addi %325, %c3_i32_132 : i32
    %327 = arith.index_cast %326 : i32 to index
    %328 = memref.load %arg2[%327] : memref<48xi32, #tpu.memory_space<smem>>
    %329 = arith.index_cast %328 : i32 to index
    %c0_133 = arith.constant 0 : index
    %330 = vector.load %arg4[%329, %c0_133] : memref<16x128xf32, #tpu.memory_space<vmem>>, vector<1x128xf32>
    %331 = arith.addf %324, %330 : vector<1x128xf32>
    %c6_i32_134 = arith.constant 6 : i32
    %332 = arith.muli %298, %c6_i32_134 : i32
    %c4_i32_135 = arith.constant 4 : i32
    %333 = arith.addi %332, %c4_i32_135 : i32
    %334 = arith.index_cast %333 : i32 to index
    %335 = memref.load %arg2[%334] : memref<48xi32, #tpu.memory_space<smem>>
    %336 = arith.index_cast %335 : i32 to index
    %c0_136 = arith.constant 0 : index
    %337 = vector.load %arg4[%336, %c0_136] : memref<16x128xf32, #tpu.memory_space<vmem>>, vector<1x128xf32>
    %338 = arith.addf %331, %337 : vector<1x128xf32>
    %c6_i32_137 = arith.constant 6 : i32
    %339 = arith.muli %298, %c6_i32_137 : i32
    %c5_i32_138 = arith.constant 5 : i32
    %340 = arith.addi %339, %c5_i32_138 : i32
    %341 = arith.index_cast %340 : i32 to index
    %342 = memref.load %arg2[%341] : memref<48xi32, #tpu.memory_space<smem>>
    %343 = arith.index_cast %342 : i32 to index
    %c0_139 = arith.constant 0 : index
    %344 = vector.load %arg4[%343, %c0_139] : memref<16x128xf32, #tpu.memory_space<vmem>>, vector<1x128xf32>
    %345 = arith.addf %338, %344 : vector<1x128xf32>
    %346 = arith.addi %0, %2 : i32
    %c7_i32 = arith.constant 7 : i32
    %347 = arith.addi %346, %c7_i32 : i32
    %348 = arith.index_cast %347 : i32 to index
    %349 = memref.load %arg1[%348] : memref<8xi32, #tpu.memory_space<smem>>
    %350 = arith.index_cast %349 : i32 to index
    %c0_140 = arith.constant 0 : index
    %351 = vector.load %arg3[%350, %c0_140] : memref<64x128xf32, #tpu.memory_space<vmem>>, vector<1x128xf32>
    %cst_141 = arith.constant 0.000000e+00 : f32
    %352 = vector.broadcast %cst_141 : f32 to vector<1x128xf32>
    %c6_i32_142 = arith.constant 6 : i32
    %353 = arith.muli %347, %c6_i32_142 : i32
    %c0_i32_143 = arith.constant 0 : i32
    %354 = arith.addi %353, %c0_i32_143 : i32
    %355 = arith.index_cast %354 : i32 to index
    %356 = memref.load %arg2[%355] : memref<48xi32, #tpu.memory_space<smem>>
    %357 = arith.index_cast %356 : i32 to index
    %c0_144 = arith.constant 0 : index
    %358 = vector.load %arg4[%357, %c0_144] : memref<16x128xf32, #tpu.memory_space<vmem>>, vector<1x128xf32>
    %359 = arith.addf %352, %358 : vector<1x128xf32>
    %c6_i32_145 = arith.constant 6 : i32
    %360 = arith.muli %347, %c6_i32_145 : i32
    %c1_i32_146 = arith.constant 1 : i32
    %361 = arith.addi %360, %c1_i32_146 : i32
    %362 = arith.index_cast %361 : i32 to index
    %363 = memref.load %arg2[%362] : memref<48xi32, #tpu.memory_space<smem>>
    %364 = arith.index_cast %363 : i32 to index
    %c0_147 = arith.constant 0 : index
    %365 = vector.load %arg4[%364, %c0_147] : memref<16x128xf32, #tpu.memory_space<vmem>>, vector<1x128xf32>
    %366 = arith.addf %359, %365 : vector<1x128xf32>
    %c6_i32_148 = arith.constant 6 : i32
    %367 = arith.muli %347, %c6_i32_148 : i32
    %c2_i32_149 = arith.constant 2 : i32
    %368 = arith.addi %367, %c2_i32_149 : i32
    %369 = arith.index_cast %368 : i32 to index
    %370 = memref.load %arg2[%369] : memref<48xi32, #tpu.memory_space<smem>>
    %371 = arith.index_cast %370 : i32 to index
    %c0_150 = arith.constant 0 : index
    %372 = vector.load %arg4[%371, %c0_150] : memref<16x128xf32, #tpu.memory_space<vmem>>, vector<1x128xf32>
    %373 = arith.addf %366, %372 : vector<1x128xf32>
    %c6_i32_151 = arith.constant 6 : i32
    %374 = arith.muli %347, %c6_i32_151 : i32
    %c3_i32_152 = arith.constant 3 : i32
    %375 = arith.addi %374, %c3_i32_152 : i32
    %376 = arith.index_cast %375 : i32 to index
    %377 = memref.load %arg2[%376] : memref<48xi32, #tpu.memory_space<smem>>
    %378 = arith.index_cast %377 : i32 to index
    %c0_153 = arith.constant 0 : index
    %379 = vector.load %arg4[%378, %c0_153] : memref<16x128xf32, #tpu.memory_space<vmem>>, vector<1x128xf32>
    %380 = arith.addf %373, %379 : vector<1x128xf32>
    %c6_i32_154 = arith.constant 6 : i32
    %381 = arith.muli %347, %c6_i32_154 : i32
    %c4_i32_155 = arith.constant 4 : i32
    %382 = arith.addi %381, %c4_i32_155 : i32
    %383 = arith.index_cast %382 : i32 to index
    %384 = memref.load %arg2[%383] : memref<48xi32, #tpu.memory_space<smem>>
    %385 = arith.index_cast %384 : i32 to index
    %c0_156 = arith.constant 0 : index
    %386 = vector.load %arg4[%385, %c0_156] : memref<16x128xf32, #tpu.memory_space<vmem>>, vector<1x128xf32>
    %387 = arith.addf %380, %386 : vector<1x128xf32>
    %c6_i32_157 = arith.constant 6 : i32
    %388 = arith.muli %347, %c6_i32_157 : i32
    %c5_i32_158 = arith.constant 5 : i32
    %389 = arith.addi %388, %c5_i32_158 : i32
    %390 = arith.index_cast %389 : i32 to index
    %391 = memref.load %arg2[%390] : memref<48xi32, #tpu.memory_space<smem>>
    %392 = arith.index_cast %391 : i32 to index
    %c0_159 = arith.constant 0 : index
    %393 = vector.load %arg4[%392, %c0_159] : memref<16x128xf32, #tpu.memory_space<vmem>>, vector<1x128xf32>
    %394 = arith.addf %387, %393 : vector<1x128xf32>
    %395 = tpu.concatenate %8, %57, %106, %155, %204, %253, %302, %351 in 0 : vector<1x128xf32>, vector<1x128xf32>, vector<1x128xf32>, vector<1x128xf32>, vector<1x128xf32>, vector<1x128xf32>, vector<1x128xf32>, vector<1x128xf32> -> vector<8x128xf32>
    %396 = tpu.concatenate %51, %100, %149, %198, %247, %296, %345, %394 in 0 : vector<1x128xf32>, vector<1x128xf32>, vector<1x128xf32>, vector<1x128xf32>, vector<1x128xf32>, vector<1x128xf32>, vector<1x128xf32>, vector<1x128xf32> -> vector<8x128xf32>
    %397 = vector.extract_strided_slice %396 {offsets = [0, 49], sizes = [8, 1], strides = [1, 1]} : vector<8x128xf32> to vector<8x1xf32>
    %cst_160 = arith.constant 1.000000e+00 : f32
    %398 = vector.broadcast %cst_160 : f32 to vector<8x1xf32>
    %399 = arith.maximumf %397, %398 : vector<8x1xf32>
    %400 = tpu.reciprocal %399 : vector<8x1xf32> -> vector<8x1xf32>
    %401 = vector.broadcast %400 : vector<8x1xf32> to vector<8x128xf32>
    %402 = arith.mulf %396, %401 : vector<8x128xf32>
    %403 = arith.addf %395, %402 : vector<8x128xf32>
    %404 = arith.index_cast %2 : i32 to index
    %c0_161 = arith.constant 0 : index
    %405 = vector.load %arg8[%404, %c0_161] : memref<8x128xf32, #tpu.memory_space<vmem>>, vector<8x128xf32>
    tpu.vector_store %arg8[%404, %c0_161], %403 {strides = array<i32>} : memref<8x128xf32, #tpu.memory_space<vmem>>, vector<8x128xf32>,
    %c1_i32_162 = arith.constant 1 : i32
    %c0_163 = arith.constant 0 : index
    %c0_164 = arith.constant 0 : index
    %406 = vector.load %arg8[%c0_163, %c0_164] : memref<8x128xf32, #tpu.memory_space<vmem>>, vector<8x128xf32>
    %407 = vector.extract_strided_slice %406 {offsets = [0, 0], sizes = [8, 1], strides = [1, 1]} : vector<8x128xf32> to vector<8x1xf32>
    %cst_165 = arith.constant 0.000000e+00 : f32
    %408 = vector.broadcast %cst_165 : f32 to vector<8x128xf32>
    %409 = arith.maximumf %406, %408 : vector<8x128xf32>
    %c0_166 = arith.constant 0 : index
    %c0_167 = arith.constant 0 : index
    %410 = vector.load %arg5[%c0_166, %c0_167] : memref<128x128xf32, #tpu.memory_space<vmem>>, vector<128x128xf32>
    %cst_168 = arith.constant dense<0.000000e+00> : vector<8x128xf32>
    %411 = tpu.matmul %409, %410, %cst_168 {dimension_numbers = #tpu.dot_dimension_numbers<[1], [0], [0], [1], [0, 0, 1, 1], [], []>} : vector<8x128xf32>, vector<128x128xf32>, vector<8x128xf32> -> vector<8x128xf32>
    %c0_169 = arith.constant 0 : index
    %c0_170 = arith.constant 0 : index
    %412 = vector.load %arg6[%c0_169, %c0_170] : memref<1x128xf32, #tpu.memory_space<vmem>>, vector<1x128xf32>
    %413 = vector.broadcast %412 : vector<1x128xf32> to vector<8x128xf32>
    %414 = arith.addf %411, %413 : vector<8x128xf32>
    %415 = tpu.iota {dimensions = array<i32: 1>} : vector<8x128xi32>
    %c32_i32 = arith.constant 32 : i32
    %416 = vector.broadcast %c32_i32 : i32 to vector<8x128xi32>
    %417 = arith.cmpi eq, %415, %416 : vector<8x128xi32>
    %418 = vector.shape_cast %407 : vector<8x1xf32> to vector<8x1xf32>
    %419 = vector.broadcast %418 : vector<8x1xf32> to vector<8x128xf32>
    %420 = arith.select %417, %419, %414 : vector<8x128xi1>, vector<8x128xf32>
    %c0_171 = arith.constant 0 : index
    %c0_172 = arith.constant 0 : index
    %421 = vector.load %arg7[%c0_171, %c0_172] : memref<8x128xf32, #tpu.memory_space<vmem>>, vector<8x128xf32>
    tpu.vector_store %arg7[%c0_171, %c0_172], %420 {strides = array<i32>} : memref<8x128xf32, #tpu.memory_space<vmem>>, vector<8x128xf32>,
    return
  }
  func.func @transform_0(%arg0: i32, %arg1: memref<8xi32, #tpu.memory_space<smem>>, %arg2: memref<48xi32, #tpu.memory_space<smem>>) -> (i32, i32) {
    %c0_i32 = arith.constant 0 : i32
    %c0_i32_0 = arith.constant 0 : i32
    %c0_i32_1 = arith.constant 0 : i32
    return %c0_i32, %c0_i32_0 : i32, i32
  }
  func.func @transform_1(%arg0: i32, %arg1: memref<8xi32, #tpu.memory_space<smem>>, %arg2: memref<48xi32, #tpu.memory_space<smem>>) -> (i32, i32) {
    %c0_i32 = arith.constant 0 : i32
    %c0_i32_0 = arith.constant 0 : i32
    %c0_i32_1 = arith.constant 0 : i32
    return %c0_i32, %c0_i32_0 : i32, i32
  }
  func.func @transform_2(%arg0: i32, %arg1: memref<8xi32, #tpu.memory_space<smem>>, %arg2: memref<48xi32, #tpu.memory_space<smem>>) -> (i32, i32) {
    %c0_i32 = arith.constant 0 : i32
    %c0_i32_0 = arith.constant 0 : i32
    %c0_i32_1 = arith.constant 0 : i32
    return %c0_i32, %c0_i32_0 : i32, i32
  }
  func.func @transform_3(%arg0: i32, %arg1: memref<8xi32, #tpu.memory_space<smem>>, %arg2: memref<48xi32, #tpu.memory_space<smem>>) -> (i32, i32) {
    %c0_i32 = arith.constant 0 : i32
    %c0_i32_0 = arith.constant 0 : i32
    %c0_i32_1 = arith.constant 0 : i32
    return %c0_i32, %c0_i32_0 : i32, i32
  }
  func.func @transform_4(%arg0: i32, %arg1: memref<8xi32, #tpu.memory_space<smem>>, %arg2: memref<48xi32, #tpu.memory_space<smem>>) -> (i32, i32) {
    %c0_i32 = arith.constant 0 : i32
    %c0_i32_0 = arith.constant 0 : i32
    return %arg0, %c0_i32 : i32, i32
  }
}

module attributes {stable_mosaic.version = 11 : i64} {
  func.func @movie_encoder_kernel(%arg0: i32, %arg1: memref<8xi32, #tpu.memory_space<smem>>, %arg2: memref<48xi32, #tpu.memory_space<smem>>, %arg3: memref<64x128xf32, #tpu.memory_space<vmem>>, %arg4: memref<16x128xf32, #tpu.memory_space<vmem>>, %arg5: memref<128x128xf32, #tpu.memory_space<vmem>>, %arg6: memref<1x128xf32, #tpu.memory_space<vmem>>, %arg7: memref<8x128xf32, #tpu.memory_space<vmem>>, %arg8: memref<8x128xf32, #tpu.memory_space<vmem>>) attributes {dimension_semantics = [#tpu.dimension_semantics<parallel>], iteration_bounds = array<i64: 1>, scalar_prefetch = 2 : i64, scratch_operands = 1 : i64, tpu.core_type = #tpu.core_type<tc>, window_params = [{pipeline_mode = #tpu.pipeline_mode<synchronous>, transform_indices = @transform_0, window_bounds = array<i64: 64, 128>}, {pipeline_mode = #tpu.pipeline_mode<synchronous>, transform_indices = @transform_1, window_bounds = array<i64: 16, 128>}, {pipeline_mode = #tpu.pipeline_mode<synchronous>, transform_indices = @transform_2, window_bounds = array<i64: 128, 128>}, {pipeline_mode = #tpu.pipeline_mode<synchronous>, transform_indices = @transform_3, window_bounds = array<i64: 1, 128>}, {transform_indices = @transform_4, window_bounds = array<i64: 8, 128>}]} {
    %c8_i32 = arith.constant 8 : i32
    %0 = arith.muli %arg0, %c8_i32 : i32
    %c0_i32 = arith.constant 0 : i32
    %c8_i32_0 = arith.constant 8 : i32
    %1 = arith.muli %c0_i32, %c8_i32_0 : i32
    %2 = tpu.assume_multiple %1, 8 : i32
    %3 = arith.addi %0, %2 : i32
    %c0_i32_1 = arith.constant 0 : i32
    %4 = arith.addi %3, %c0_i32_1 : i32
    %5 = arith.index_cast %4 : i32 to index
    %6 = memref.load %arg1[%5] : memref<8xi32, #tpu.memory_space<smem>>
    %7 = arith.index_cast %6 : i32 to index
    %c0 = arith.constant 0 : index
    %8 = vector.load %arg3[%7, %c0] : memref<64x128xf32, #tpu.memory_space<vmem>>, vector<1x128xf32>
    %cst = arith.constant 0.000000e+00 : f32
    %9 = vector.broadcast %cst : f32 to vector<1x128xf32>
    %c6_i32 = arith.constant 6 : i32
    %10 = arith.muli %4, %c6_i32 : i32
    %c0_i32_2 = arith.constant 0 : i32
    %11 = arith.addi %10, %c0_i32_2 : i32
    %12 = arith.index_cast %11 : i32 to index
    %13 = memref.load %arg2[%12] : memref<48xi32, #tpu.memory_space<smem>>
    %14 = arith.index_cast %13 : i32 to index
    %c0_3 = arith.constant 0 : index
    %15 = vector.load %arg4[%14, %c0_3] : memref<16x128xf32, #tpu.memory_space<vmem>>, vector<1x128xf32>
    %16 = arith.addf %9, %15 : vector<1x128xf32>
    %c6_i32_4 = arith.constant 6 : i32
    %17 = arith.muli %4, %c6_i32_4 : i32
    %c1_i32 = arith.constant 1 : i32
    %18 = arith.addi %17, %c1_i32 : i32
    %19 = arith.index_cast %18 : i32 to index
    %20 = memref.load %arg2[%19] : memref<48xi32, #tpu.memory_space<smem>>
    %21 = arith.index_cast %20 : i32 to index
    %c0_5 = arith.constant 0 : index
    %22 = vector.load %arg4[%21, %c0_5] : memref<16x128xf32, #tpu.memory_space<vmem>>, vector<1x128xf32>
    %23 = arith.addf %16, %22 : vector<1x128xf32>
    %c6_i32_6 = arith.constant 6 : i32
    %24 = arith.muli %4, %c6_i32_6 : i32
    %c2_i32 = arith.constant 2 : i32
    %25 = arith.addi %24, %c2_i32 : i32
    %26 = arith.index_cast %25 : i32 to index
    %27 = memref.load %arg2[%26] : memref<48xi32, #tpu.memory_space<smem>>
    %28 = arith.index_cast %27 : i32 to index
    %c0_7 = arith.constant 0 : index
    %29 = vector.load %arg4[%28, %c0_7] : memref<16x128xf32, #tpu.memory_space<vmem>>, vector<1x128xf32>
    %30 = arith.addf %23, %29 : vector<1x128xf32>
    %c6_i32_8 = arith.constant 6 : i32
    %31 = arith.muli %4, %c6_i32_8 : i32
    %c3_i32 = arith.constant 3 : i32
    %32 = arith.addi %31, %c3_i32 : i32
    %33 = arith.index_cast %32 : i32 to index
    %34 = memref.load %arg2[%33] : memref<48xi32, #tpu.memory_space<smem>>
    %35 = arith.index_cast %34 : i32 to index
    %c0_9 = arith.constant 0 : index
    %36 = vector.load %arg4[%35, %c0_9] : memref<16x128xf32, #tpu.memory_space<vmem>>, vector<1x128xf32>
    %37 = arith.addf %30, %36 : vector<1x128xf32>
    %c6_i32_10 = arith.constant 6 : i32
    %38 = arith.muli %4, %c6_i32_10 : i32
    %c4_i32 = arith.constant 4 : i32
    %39 = arith.addi %38, %c4_i32 : i32
    %40 = arith.index_cast %39 : i32 to index
    %41 = memref.load %arg2[%40] : memref<48xi32, #tpu.memory_space<smem>>
    %42 = arith.index_cast %41 : i32 to index
    %c0_11 = arith.constant 0 : index
    %43 = vector.load %arg4[%42, %c0_11] : memref<16x128xf32, #tpu.memory_space<vmem>>, vector<1x128xf32>
    %44 = arith.addf %37, %43 : vector<1x128xf32>
    %c6_i32_12 = arith.constant 6 : i32
    %45 = arith.muli %4, %c6_i32_12 : i32
    %c5_i32 = arith.constant 5 : i32
    %46 = arith.addi %45, %c5_i32 : i32
    %47 = arith.index_cast %46 : i32 to index
    %48 = memref.load %arg2[%47] : memref<48xi32, #tpu.memory_space<smem>>
    %49 = arith.index_cast %48 : i32 to index
    %c0_13 = arith.constant 0 : index
    %50 = vector.load %arg4[%49, %c0_13] : memref<16x128xf32, #tpu.memory_space<vmem>>, vector<1x128xf32>
    %51 = arith.addf %44, %50 : vector<1x128xf32>
    %52 = arith.addi %0, %2 : i32
    %c1_i32_14 = arith.constant 1 : i32
    %53 = arith.addi %52, %c1_i32_14 : i32
    %54 = arith.index_cast %53 : i32 to index
    %55 = memref.load %arg1[%54] : memref<8xi32, #tpu.memory_space<smem>>
    %56 = arith.index_cast %55 : i32 to index
    %c0_15 = arith.constant 0 : index
    %57 = vector.load %arg3[%56, %c0_15] : memref<64x128xf32, #tpu.memory_space<vmem>>, vector<1x128xf32>
    %cst_16 = arith.constant 0.000000e+00 : f32
    %58 = vector.broadcast %cst_16 : f32 to vector<1x128xf32>
    %c6_i32_17 = arith.constant 6 : i32
    %59 = arith.muli %53, %c6_i32_17 : i32
    %c0_i32_18 = arith.constant 0 : i32
    %60 = arith.addi %59, %c0_i32_18 : i32
    %61 = arith.index_cast %60 : i32 to index
    %62 = memref.load %arg2[%61] : memref<48xi32, #tpu.memory_space<smem>>
    %63 = arith.index_cast %62 : i32 to index
    %c0_19 = arith.constant 0 : index
    %64 = vector.load %arg4[%63, %c0_19] : memref<16x128xf32, #tpu.memory_space<vmem>>, vector<1x128xf32>
    %65 = arith.addf %58, %64 : vector<1x128xf32>
    %c6_i32_20 = arith.constant 6 : i32
    %66 = arith.muli %53, %c6_i32_20 : i32
    %c1_i32_21 = arith.constant 1 : i32
    %67 = arith.addi %66, %c1_i32_21 : i32
    %68 = arith.index_cast %67 : i32 to index
    %69 = memref.load %arg2[%68] : memref<48xi32, #tpu.memory_space<smem>>
    %70 = arith.index_cast %69 : i32 to index
    %c0_22 = arith.constant 0 : index
    %71 = vector.load %arg4[%70, %c0_22] : memref<16x128xf32, #tpu.memory_space<vmem>>, vector<1x128xf32>
    %72 = arith.addf %65, %71 : vector<1x128xf32>
    %c6_i32_23 = arith.constant 6 : i32
    %73 = arith.muli %53, %c6_i32_23 : i32
    %c2_i32_24 = arith.constant 2 : i32
    %74 = arith.addi %73, %c2_i32_24 : i32
    %75 = arith.index_cast %74 : i32 to index
    %76 = memref.load %arg2[%75] : memref<48xi32, #tpu.memory_space<smem>>
    %77 = arith.index_cast %76 : i32 to index
    %c0_25 = arith.constant 0 : index
    %78 = vector.load %arg4[%77, %c0_25] : memref<16x128xf32, #tpu.memory_space<vmem>>, vector<1x128xf32>
    %79 = arith.addf %72, %78 : vector<1x128xf32>
    %c6_i32_26 = arith.constant 6 : i32
    %80 = arith.muli %53, %c6_i32_26 : i32
    %c3_i32_27 = arith.constant 3 : i32
    %81 = arith.addi %80, %c3_i32_27 : i32
    %82 = arith.index_cast %81 : i32 to index
    %83 = memref.load %arg2[%82] : memref<48xi32, #tpu.memory_space<smem>>
    %84 = arith.index_cast %83 : i32 to index
    %c0_28 = arith.constant 0 : index
    %85 = vector.load %arg4[%84, %c0_28] : memref<16x128xf32, #tpu.memory_space<vmem>>, vector<1x128xf32>
    %86 = arith.addf %79, %85 : vector<1x128xf32>
    %c6_i32_29 = arith.constant 6 : i32
    %87 = arith.muli %53, %c6_i32_29 : i32
    %c4_i32_30 = arith.constant 4 : i32
    %88 = arith.addi %87, %c4_i32_30 : i32
    %89 = arith.index_cast %88 : i32 to index
    %90 = memref.load %arg2[%89] : memref<48xi32, #tpu.memory_space<smem>>
    %91 = arith.index_cast %90 : i32 to index
    %c0_31 = arith.constant 0 : index
    %92 = vector.load %arg4[%91, %c0_31] : memref<16x128xf32, #tpu.memory_space<vmem>>, vector<1x128xf32>
    %93 = arith.addf %86, %92 : vector<1x128xf32>
    %c6_i32_32 = arith.constant 6 : i32
    %94 = arith.muli %53, %c6_i32_32 : i32
    %c5_i32_33 = arith.constant 5 : i32
    %95 = arith.addi %94, %c5_i32_33 : i32
    %96 = arith.index_cast %95 : i32 to index
    %97 = memref.load %arg2[%96] : memref<48xi32, #tpu.memory_space<smem>>
    %98 = arith.index_cast %97 : i32 to index
    %c0_34 = arith.constant 0 : index
    %99 = vector.load %arg4[%98, %c0_34] : memref<16x128xf32, #tpu.memory_space<vmem>>, vector<1x128xf32>
    %100 = arith.addf %93, %99 : vector<1x128xf32>
    %101 = arith.addi %0, %2 : i32
    %c2_i32_35 = arith.constant 2 : i32
    %102 = arith.addi %101, %c2_i32_35 : i32
    %103 = arith.index_cast %102 : i32 to index
    %104 = memref.load %arg1[%103] : memref<8xi32, #tpu.memory_space<smem>>
    %105 = arith.index_cast %104 : i32 to index
    %c0_36 = arith.constant 0 : index
    %106 = vector.load %arg3[%105, %c0_36] : memref<64x128xf32, #tpu.memory_space<vmem>>, vector<1x128xf32>
    %cst_37 = arith.constant 0.000000e+00 : f32
    %107 = vector.broadcast %cst_37 : f32 to vector<1x128xf32>
    %c6_i32_38 = arith.constant 6 : i32
    %108 = arith.muli %102, %c6_i32_38 : i32
    %c0_i32_39 = arith.constant 0 : i32
    %109 = arith.addi %108, %c0_i32_39 : i32
    %110 = arith.index_cast %109 : i32 to index
    %111 = memref.load %arg2[%110] : memref<48xi32, #tpu.memory_space<smem>>
    %112 = arith.index_cast %111 : i32 to index
    %c0_40 = arith.constant 0 : index
    %113 = vector.load %arg4[%112, %c0_40] : memref<16x128xf32, #tpu.memory_space<vmem>>, vector<1x128xf32>
    %114 = arith.addf %107, %113 : vector<1x128xf32>
    %c6_i32_41 = arith.constant 6 : i32
    %115 = arith.muli %102, %c6_i32_41 : i32
    %c1_i32_42 = arith.constant 1 : i32
    %116 = arith.addi %115, %c1_i32_42 : i32
    %117 = arith.index_cast %116 : i32 to index
    %118 = memref.load %arg2[%117] : memref<48xi32, #tpu.memory_space<smem>>
    %119 = arith.index_cast %118 : i32 to index
    %c0_43 = arith.constant 0 : index
    %120 = vector.load %arg4[%119, %c0_43] : memref<16x128xf32, #tpu.memory_space<vmem>>, vector<1x128xf32>
    %121 = arith.addf %114, %120 : vector<1x128xf32>
    %c6_i32_44 = arith.constant 6 : i32
    %122 = arith.muli %102, %c6_i32_44 : i32
    %c2_i32_45 = arith.constant 2 : i32
    %123 = arith.addi %122, %c2_i32_45 : i32
    %124 = arith.index_cast %123 : i32 to index
    %125 = memref.load %arg2[%124] : memref<48xi32, #tpu.memory_space<smem>>
    %126 = arith.index_cast %125 : i32 to index
    %c0_46 = arith.constant 0 : index
    %127 = vector.load %arg4[%126, %c0_46] : memref<16x128xf32, #tpu.memory_space<vmem>>, vector<1x128xf32>
    %128 = arith.addf %121, %127 : vector<1x128xf32>
    %c6_i32_47 = arith.constant 6 : i32
    %129 = arith.muli %102, %c6_i32_47 : i32
    %c3_i32_48 = arith.constant 3 : i32
    %130 = arith.addi %129, %c3_i32_48 : i32
    %131 = arith.index_cast %130 : i32 to index
    %132 = memref.load %arg2[%131] : memref<48xi32, #tpu.memory_space<smem>>
    %133 = arith.index_cast %132 : i32 to index
    %c0_49 = arith.constant 0 : index
    %134 = vector.load %arg4[%133, %c0_49] : memref<16x128xf32, #tpu.memory_space<vmem>>, vector<1x128xf32>
    %135 = arith.addf %128, %134 : vector<1x128xf32>
    %c6_i32_50 = arith.constant 6 : i32
    %136 = arith.muli %102, %c6_i32_50 : i32
    %c4_i32_51 = arith.constant 4 : i32
    %137 = arith.addi %136, %c4_i32_51 : i32
    %138 = arith.index_cast %137 : i32 to index
    %139 = memref.load %arg2[%138] : memref<48xi32, #tpu.memory_space<smem>>
    %140 = arith.index_cast %139 : i32 to index
    %c0_52 = arith.constant 0 : index
    %141 = vector.load %arg4[%140, %c0_52] : memref<16x128xf32, #tpu.memory_space<vmem>>, vector<1x128xf32>
    %142 = arith.addf %135, %141 : vector<1x128xf32>
    %c6_i32_53 = arith.constant 6 : i32
    %143 = arith.muli %102, %c6_i32_53 : i32
    %c5_i32_54 = arith.constant 5 : i32
    %144 = arith.addi %143, %c5_i32_54 : i32
    %145 = arith.index_cast %144 : i32 to index
    %146 = memref.load %arg2[%145] : memref<48xi32, #tpu.memory_space<smem>>
    %147 = arith.index_cast %146 : i32 to index
    %c0_55 = arith.constant 0 : index
    %148 = vector.load %arg4[%147, %c0_55] : memref<16x128xf32, #tpu.memory_space<vmem>>, vector<1x128xf32>
    %149 = arith.addf %142, %148 : vector<1x128xf32>
    %150 = arith.addi %0, %2 : i32
    %c3_i32_56 = arith.constant 3 : i32
    %151 = arith.addi %150, %c3_i32_56 : i32
    %152 = arith.index_cast %151 : i32 to index
    %153 = memref.load %arg1[%152] : memref<8xi32, #tpu.memory_space<smem>>
    %154 = arith.index_cast %153 : i32 to index
    %c0_57 = arith.constant 0 : index
    %155 = vector.load %arg3[%154, %c0_57] : memref<64x128xf32, #tpu.memory_space<vmem>>, vector<1x128xf32>
    %cst_58 = arith.constant 0.000000e+00 : f32
    %156 = vector.broadcast %cst_58 : f32 to vector<1x128xf32>
    %c6_i32_59 = arith.constant 6 : i32
    %157 = arith.muli %151, %c6_i32_59 : i32
    %c0_i32_60 = arith.constant 0 : i32
    %158 = arith.addi %157, %c0_i32_60 : i32
    %159 = arith.index_cast %158 : i32 to index
    %160 = memref.load %arg2[%159] : memref<48xi32, #tpu.memory_space<smem>>
    %161 = arith.index_cast %160 : i32 to index
    %c0_61 = arith.constant 0 : index
    %162 = vector.load %arg4[%161, %c0_61] : memref<16x128xf32, #tpu.memory_space<vmem>>, vector<1x128xf32>
    %163 = arith.addf %156, %162 : vector<1x128xf32>
    %c6_i32_62 = arith.constant 6 : i32
    %164 = arith.muli %151, %c6_i32_62 : i32
    %c1_i32_63 = arith.constant 1 : i32
    %165 = arith.addi %164, %c1_i32_63 : i32
    %166 = arith.index_cast %165 : i32 to index
    %167 = memref.load %arg2[%166] : memref<48xi32, #tpu.memory_space<smem>>
    %168 = arith.index_cast %167 : i32 to index
    %c0_64 = arith.constant 0 : index
    %169 = vector.load %arg4[%168, %c0_64] : memref<16x128xf32, #tpu.memory_space<vmem>>, vector<1x128xf32>
    %170 = arith.addf %163, %169 : vector<1x128xf32>
    %c6_i32_65 = arith.constant 6 : i32
    %171 = arith.muli %151, %c6_i32_65 : i32
    %c2_i32_66 = arith.constant 2 : i32
    %172 = arith.addi %171, %c2_i32_66 : i32
    %173 = arith.index_cast %172 : i32 to index
    %174 = memref.load %arg2[%173] : memref<48xi32, #tpu.memory_space<smem>>
    %175 = arith.index_cast %174 : i32 to index
    %c0_67 = arith.constant 0 : index
    %176 = vector.load %arg4[%175, %c0_67] : memref<16x128xf32, #tpu.memory_space<vmem>>, vector<1x128xf32>
    %177 = arith.addf %170, %176 : vector<1x128xf32>
    %c6_i32_68 = arith.constant 6 : i32
    %178 = arith.muli %151, %c6_i32_68 : i32
    %c3_i32_69 = arith.constant 3 : i32
    %179 = arith.addi %178, %c3_i32_69 : i32
    %180 = arith.index_cast %179 : i32 to index
    %181 = memref.load %arg2[%180] : memref<48xi32, #tpu.memory_space<smem>>
    %182 = arith.index_cast %181 : i32 to index
    %c0_70 = arith.constant 0 : index
    %183 = vector.load %arg4[%182, %c0_70] : memref<16x128xf32, #tpu.memory_space<vmem>>, vector<1x128xf32>
    %184 = arith.addf %177, %183 : vector<1x128xf32>
    %c6_i32_71 = arith.constant 6 : i32
    %185 = arith.muli %151, %c6_i32_71 : i32
    %c4_i32_72 = arith.constant 4 : i32
    %186 = arith.addi %185, %c4_i32_72 : i32
    %187 = arith.index_cast %186 : i32 to index
    %188 = memref.load %arg2[%187] : memref<48xi32, #tpu.memory_space<smem>>
    %189 = arith.index_cast %188 : i32 to index
    %c0_73 = arith.constant 0 : index
    %190 = vector.load %arg4[%189, %c0_73] : memref<16x128xf32, #tpu.memory_space<vmem>>, vector<1x128xf32>
    %191 = arith.addf %184, %190 : vector<1x128xf32>
    %c6_i32_74 = arith.constant 6 : i32
    %192 = arith.muli %151, %c6_i32_74 : i32
    %c5_i32_75 = arith.constant 5 : i32
    %193 = arith.addi %192, %c5_i32_75 : i32
    %194 = arith.index_cast %193 : i32 to index
    %195 = memref.load %arg2[%194] : memref<48xi32, #tpu.memory_space<smem>>
    %196 = arith.index_cast %195 : i32 to index
    %c0_76 = arith.constant 0 : index
    %197 = vector.load %arg4[%196, %c0_76] : memref<16x128xf32, #tpu.memory_space<vmem>>, vector<1x128xf32>
    %198 = arith.addf %191, %197 : vector<1x128xf32>
    %199 = arith.addi %0, %2 : i32
    %c4_i32_77 = arith.constant 4 : i32
    %200 = arith.addi %199, %c4_i32_77 : i32
    %201 = arith.index_cast %200 : i32 to index
    %202 = memref.load %arg1[%201] : memref<8xi32, #tpu.memory_space<smem>>
    %203 = arith.index_cast %202 : i32 to index
    %c0_78 = arith.constant 0 : index
    %204 = vector.load %arg3[%203, %c0_78] : memref<64x128xf32, #tpu.memory_space<vmem>>, vector<1x128xf32>
    %cst_79 = arith.constant 0.000000e+00 : f32
    %205 = vector.broadcast %cst_79 : f32 to vector<1x128xf32>
    %c6_i32_80 = arith.constant 6 : i32
    %206 = arith.muli %200, %c6_i32_80 : i32
    %c0_i32_81 = arith.constant 0 : i32
    %207 = arith.addi %206, %c0_i32_81 : i32
    %208 = arith.index_cast %207 : i32 to index
    %209 = memref.load %arg2[%208] : memref<48xi32, #tpu.memory_space<smem>>
    %210 = arith.index_cast %209 : i32 to index
    %c0_82 = arith.constant 0 : index
    %211 = vector.load %arg4[%210, %c0_82] : memref<16x128xf32, #tpu.memory_space<vmem>>, vector<1x128xf32>
    %212 = arith.addf %205, %211 : vector<1x128xf32>
    %c6_i32_83 = arith.constant 6 : i32
    %213 = arith.muli %200, %c6_i32_83 : i32
    %c1_i32_84 = arith.constant 1 : i32
    %214 = arith.addi %213, %c1_i32_84 : i32
    %215 = arith.index_cast %214 : i32 to index
    %216 = memref.load %arg2[%215] : memref<48xi32, #tpu.memory_space<smem>>
    %217 = arith.index_cast %216 : i32 to index
    %c0_85 = arith.constant 0 : index
    %218 = vector.load %arg4[%217, %c0_85] : memref<16x128xf32, #tpu.memory_space<vmem>>, vector<1x128xf32>
    %219 = arith.addf %212, %218 : vector<1x128xf32>
    %c6_i32_86 = arith.constant 6 : i32
    %220 = arith.muli %200, %c6_i32_86 : i32
    %c2_i32_87 = arith.constant 2 : i32
    %221 = arith.addi %220, %c2_i32_87 : i32
    %222 = arith.index_cast %221 : i32 to index
    %223 = memref.load %arg2[%222] : memref<48xi32, #tpu.memory_space<smem>>
    %224 = arith.index_cast %223 : i32 to index
    %c0_88 = arith.constant 0 : index
    %225 = vector.load %arg4[%224, %c0_88] : memref<16x128xf32, #tpu.memory_space<vmem>>, vector<1x128xf32>
    %226 = arith.addf %219, %225 : vector<1x128xf32>
    %c6_i32_89 = arith.constant 6 : i32
    %227 = arith.muli %200, %c6_i32_89 : i32
    %c3_i32_90 = arith.constant 3 : i32
    %228 = arith.addi %227, %c3_i32_90 : i32
    %229 = arith.index_cast %228 : i32 to index
    %230 = memref.load %arg2[%229] : memref<48xi32, #tpu.memory_space<smem>>
    %231 = arith.index_cast %230 : i32 to index
    %c0_91 = arith.constant 0 : index
    %232 = vector.load %arg4[%231, %c0_91] : memref<16x128xf32, #tpu.memory_space<vmem>>, vector<1x128xf32>
    %233 = arith.addf %226, %232 : vector<1x128xf32>
    %c6_i32_92 = arith.constant 6 : i32
    %234 = arith.muli %200, %c6_i32_92 : i32
    %c4_i32_93 = arith.constant 4 : i32
    %235 = arith.addi %234, %c4_i32_93 : i32
    %236 = arith.index_cast %235 : i32 to index
    %237 = memref.load %arg2[%236] : memref<48xi32, #tpu.memory_space<smem>>
    %238 = arith.index_cast %237 : i32 to index
    %c0_94 = arith.constant 0 : index
    %239 = vector.load %arg4[%238, %c0_94] : memref<16x128xf32, #tpu.memory_space<vmem>>, vector<1x128xf32>
    %240 = arith.addf %233, %239 : vector<1x128xf32>
    %c6_i32_95 = arith.constant 6 : i32
    %241 = arith.muli %200, %c6_i32_95 : i32
    %c5_i32_96 = arith.constant 5 : i32
    %242 = arith.addi %241, %c5_i32_96 : i32
    %243 = arith.index_cast %242 : i32 to index
    %244 = memref.load %arg2[%243] : memref<48xi32, #tpu.memory_space<smem>>
    %245 = arith.index_cast %244 : i32 to index
    %c0_97 = arith.constant 0 : index
    %246 = vector.load %arg4[%245, %c0_97] : memref<16x128xf32, #tpu.memory_space<vmem>>, vector<1x128xf32>
    %247 = arith.addf %240, %246 : vector<1x128xf32>
    %248 = arith.addi %0, %2 : i32
    %c5_i32_98 = arith.constant 5 : i32
    %249 = arith.addi %248, %c5_i32_98 : i32
    %250 = arith.index_cast %249 : i32 to index
    %251 = memref.load %arg1[%250] : memref<8xi32, #tpu.memory_space<smem>>
    %252 = arith.index_cast %251 : i32 to index
    %c0_99 = arith.constant 0 : index
    %253 = vector.load %arg3[%252, %c0_99] : memref<64x128xf32, #tpu.memory_space<vmem>>, vector<1x128xf32>
    %cst_100 = arith.constant 0.000000e+00 : f32
    %254 = vector.broadcast %cst_100 : f32 to vector<1x128xf32>
    %c6_i32_101 = arith.constant 6 : i32
    %255 = arith.muli %249, %c6_i32_101 : i32
    %c0_i32_102 = arith.constant 0 : i32
    %256 = arith.addi %255, %c0_i32_102 : i32
    %257 = arith.index_cast %256 : i32 to index
    %258 = memref.load %arg2[%257] : memref<48xi32, #tpu.memory_space<smem>>
    %259 = arith.index_cast %258 : i32 to index
    %c0_103 = arith.constant 0 : index
    %260 = vector.load %arg4[%259, %c0_103] : memref<16x128xf32, #tpu.memory_space<vmem>>, vector<1x128xf32>
    %261 = arith.addf %254, %260 : vector<1x128xf32>
    %c6_i32_104 = arith.constant 6 : i32
    %262 = arith.muli %249, %c6_i32_104 : i32
    %c1_i32_105 = arith.constant 1 : i32
    %263 = arith.addi %262, %c1_i32_105 : i32
    %264 = arith.index_cast %263 : i32 to index
    %265 = memref.load %arg2[%264] : memref<48xi32, #tpu.memory_space<smem>>
    %266 = arith.index_cast %265 : i32 to index
    %c0_106 = arith.constant 0 : index
    %267 = vector.load %arg4[%266, %c0_106] : memref<16x128xf32, #tpu.memory_space<vmem>>, vector<1x128xf32>
    %268 = arith.addf %261, %267 : vector<1x128xf32>
    %c6_i32_107 = arith.constant 6 : i32
    %269 = arith.muli %249, %c6_i32_107 : i32
    %c2_i32_108 = arith.constant 2 : i32
    %270 = arith.addi %269, %c2_i32_108 : i32
    %271 = arith.index_cast %270 : i32 to index
    %272 = memref.load %arg2[%271] : memref<48xi32, #tpu.memory_space<smem>>
    %273 = arith.index_cast %272 : i32 to index
    %c0_109 = arith.constant 0 : index
    %274 = vector.load %arg4[%273, %c0_109] : memref<16x128xf32, #tpu.memory_space<vmem>>, vector<1x128xf32>
    %275 = arith.addf %268, %274 : vector<1x128xf32>
    %c6_i32_110 = arith.constant 6 : i32
    %276 = arith.muli %249, %c6_i32_110 : i32
    %c3_i32_111 = arith.constant 3 : i32
    %277 = arith.addi %276, %c3_i32_111 : i32
    %278 = arith.index_cast %277 : i32 to index
    %279 = memref.load %arg2[%278] : memref<48xi32, #tpu.memory_space<smem>>
    %280 = arith.index_cast %279 : i32 to index
    %c0_112 = arith.constant 0 : index
    %281 = vector.load %arg4[%280, %c0_112] : memref<16x128xf32, #tpu.memory_space<vmem>>, vector<1x128xf32>
    %282 = arith.addf %275, %281 : vector<1x128xf32>
    %c6_i32_113 = arith.constant 6 : i32
    %283 = arith.muli %249, %c6_i32_113 : i32
    %c4_i32_114 = arith.constant 4 : i32
    %284 = arith.addi %283, %c4_i32_114 : i32
    %285 = arith.index_cast %284 : i32 to index
    %286 = memref.load %arg2[%285] : memref<48xi32, #tpu.memory_space<smem>>
    %287 = arith.index_cast %286 : i32 to index
    %c0_115 = arith.constant 0 : index
    %288 = vector.load %arg4[%287, %c0_115] : memref<16x128xf32, #tpu.memory_space<vmem>>, vector<1x128xf32>
    %289 = arith.addf %282, %288 : vector<1x128xf32>
    %c6_i32_116 = arith.constant 6 : i32
    %290 = arith.muli %249, %c6_i32_116 : i32
    %c5_i32_117 = arith.constant 5 : i32
    %291 = arith.addi %290, %c5_i32_117 : i32
    %292 = arith.index_cast %291 : i32 to index
    %293 = memref.load %arg2[%292] : memref<48xi32, #tpu.memory_space<smem>>
    %294 = arith.index_cast %293 : i32 to index
    %c0_118 = arith.constant 0 : index
    %295 = vector.load %arg4[%294, %c0_118] : memref<16x128xf32, #tpu.memory_space<vmem>>, vector<1x128xf32>
    %296 = arith.addf %289, %295 : vector<1x128xf32>
    %297 = arith.addi %0, %2 : i32
    %c6_i32_119 = arith.constant 6 : i32
    %298 = arith.addi %297, %c6_i32_119 : i32
    %299 = arith.index_cast %298 : i32 to index
    %300 = memref.load %arg1[%299] : memref<8xi32, #tpu.memory_space<smem>>
    %301 = arith.index_cast %300 : i32 to index
    %c0_120 = arith.constant 0 : index
    %302 = vector.load %arg3[%301, %c0_120] : memref<64x128xf32, #tpu.memory_space<vmem>>, vector<1x128xf32>
    %cst_121 = arith.constant 0.000000e+00 : f32
    %303 = vector.broadcast %cst_121 : f32 to vector<1x128xf32>
    %c6_i32_122 = arith.constant 6 : i32
    %304 = arith.muli %298, %c6_i32_122 : i32
    %c0_i32_123 = arith.constant 0 : i32
    %305 = arith.addi %304, %c0_i32_123 : i32
    %306 = arith.index_cast %305 : i32 to index
    %307 = memref.load %arg2[%306] : memref<48xi32, #tpu.memory_space<smem>>
    %308 = arith.index_cast %307 : i32 to index
    %c0_124 = arith.constant 0 : index
    %309 = vector.load %arg4[%308, %c0_124] : memref<16x128xf32, #tpu.memory_space<vmem>>, vector<1x128xf32>
    %310 = arith.addf %303, %309 : vector<1x128xf32>
    %c6_i32_125 = arith.constant 6 : i32
    %311 = arith.muli %298, %c6_i32_125 : i32
    %c1_i32_126 = arith.constant 1 : i32
    %312 = arith.addi %311, %c1_i32_126 : i32
    %313 = arith.index_cast %312 : i32 to index
    %314 = memref.load %arg2[%313] : memref<48xi32, #tpu.memory_space<smem>>
    %315 = arith.index_cast %314 : i32 to index
    %c0_127 = arith.constant 0 : index
    %316 = vector.load %arg4[%315, %c0_127] : memref<16x128xf32, #tpu.memory_space<vmem>>, vector<1x128xf32>
    %317 = arith.addf %310, %316 : vector<1x128xf32>
    %c6_i32_128 = arith.constant 6 : i32
    %318 = arith.muli %298, %c6_i32_128 : i32
    %c2_i32_129 = arith.constant 2 : i32
    %319 = arith.addi %318, %c2_i32_129 : i32
    %320 = arith.index_cast %319 : i32 to index
    %321 = memref.load %arg2[%320] : memref<48xi32, #tpu.memory_space<smem>>
    %322 = arith.index_cast %321 : i32 to index
    %c0_130 = arith.constant 0 : index
    %323 = vector.load %arg4[%322, %c0_130] : memref<16x128xf32, #tpu.memory_space<vmem>>, vector<1x128xf32>
    %324 = arith.addf %317, %323 : vector<1x128xf32>
    %c6_i32_131 = arith.constant 6 : i32
    %325 = arith.muli %298, %c6_i32_131 : i32
    %c3_i32_132 = arith.constant 3 : i32
    %326 = arith.addi %325, %c3_i32_132 : i32
    %327 = arith.index_cast %326 : i32 to index
    %328 = memref.load %arg2[%327] : memref<48xi32, #tpu.memory_space<smem>>
    %329 = arith.index_cast %328 : i32 to index
    %c0_133 = arith.constant 0 : index
    %330 = vector.load %arg4[%329, %c0_133] : memref<16x128xf32, #tpu.memory_space<vmem>>, vector<1x128xf32>
    %331 = arith.addf %324, %330 : vector<1x128xf32>
    %c6_i32_134 = arith.constant 6 : i32
    %332 = arith.muli %298, %c6_i32_134 : i32
    %c4_i32_135 = arith.constant 4 : i32
    %333 = arith.addi %332, %c4_i32_135 : i32
    %334 = arith.index_cast %333 : i32 to index
    %335 = memref.load %arg2[%334] : memref<48xi32, #tpu.memory_space<smem>>
    %336 = arith.index_cast %335 : i32 to index
    %c0_136 = arith.constant 0 : index
    %337 = vector.load %arg4[%336, %c0_136] : memref<16x128xf32, #tpu.memory_space<vmem>>, vector<1x128xf32>
    %338 = arith.addf %331, %337 : vector<1x128xf32>
    %c6_i32_137 = arith.constant 6 : i32
    %339 = arith.muli %298, %c6_i32_137 : i32
    %c5_i32_138 = arith.constant 5 : i32
    %340 = arith.addi %339, %c5_i32_138 : i32
    %341 = arith.index_cast %340 : i32 to index
    %342 = memref.load %arg2[%341] : memref<48xi32, #tpu.memory_space<smem>>
    %343 = arith.index_cast %342 : i32 to index
    %c0_139 = arith.constant 0 : index
    %344 = vector.load %arg4[%343, %c0_139] : memref<16x128xf32, #tpu.memory_space<vmem>>, vector<1x128xf32>
    %345 = arith.addf %338, %344 : vector<1x128xf32>
    %346 = arith.addi %0, %2 : i32
    %c7_i32 = arith.constant 7 : i32
    %347 = arith.addi %346, %c7_i32 : i32
    %348 = arith.index_cast %347 : i32 to index
    %349 = memref.load %arg1[%348] : memref<8xi32, #tpu.memory_space<smem>>
    %350 = arith.index_cast %349 : i32 to index
    %c0_140 = arith.constant 0 : index
    %351 = vector.load %arg3[%350, %c0_140] : memref<64x128xf32, #tpu.memory_space<vmem>>, vector<1x128xf32>
    %cst_141 = arith.constant 0.000000e+00 : f32
    %352 = vector.broadcast %cst_141 : f32 to vector<1x128xf32>
    %c6_i32_142 = arith.constant 6 : i32
    %353 = arith.muli %347, %c6_i32_142 : i32
    %c0_i32_143 = arith.constant 0 : i32
    %354 = arith.addi %353, %c0_i32_143 : i32
    %355 = arith.index_cast %354 : i32 to index
    %356 = memref.load %arg2[%355] : memref<48xi32, #tpu.memory_space<smem>>
    %357 = arith.index_cast %356 : i32 to index
    %c0_144 = arith.constant 0 : index
    %358 = vector.load %arg4[%357, %c0_144] : memref<16x128xf32, #tpu.memory_space<vmem>>, vector<1x128xf32>
    %359 = arith.addf %352, %358 : vector<1x128xf32>
    %c6_i32_145 = arith.constant 6 : i32
    %360 = arith.muli %347, %c6_i32_145 : i32
    %c1_i32_146 = arith.constant 1 : i32
    %361 = arith.addi %360, %c1_i32_146 : i32
    %362 = arith.index_cast %361 : i32 to index
    %363 = memref.load %arg2[%362] : memref<48xi32, #tpu.memory_space<smem>>
    %364 = arith.index_cast %363 : i32 to index
    %c0_147 = arith.constant 0 : index
    %365 = vector.load %arg4[%364, %c0_147] : memref<16x128xf32, #tpu.memory_space<vmem>>, vector<1x128xf32>
    %366 = arith.addf %359, %365 : vector<1x128xf32>
    %c6_i32_148 = arith.constant 6 : i32
    %367 = arith.muli %347, %c6_i32_148 : i32
    %c2_i32_149 = arith.constant 2 : i32
    %368 = arith.addi %367, %c2_i32_149 : i32
    %369 = arith.index_cast %368 : i32 to index
    %370 = memref.load %arg2[%369] : memref<48xi32, #tpu.memory_space<smem>>
    %371 = arith.index_cast %370 : i32 to index
    %c0_150 = arith.constant 0 : index
    %372 = vector.load %arg4[%371, %c0_150] : memref<16x128xf32, #tpu.memory_space<vmem>>, vector<1x128xf32>
    %373 = arith.addf %366, %372 : vector<1x128xf32>
    %c6_i32_151 = arith.constant 6 : i32
    %374 = arith.muli %347, %c6_i32_151 : i32
    %c3_i32_152 = arith.constant 3 : i32
    %375 = arith.addi %374, %c3_i32_152 : i32
    %376 = arith.index_cast %375 : i32 to index
    %377 = memref.load %arg2[%376] : memref<48xi32, #tpu.memory_space<smem>>
    %378 = arith.index_cast %377 : i32 to index
    %c0_153 = arith.constant 0 : index
    %379 = vector.load %arg4[%378, %c0_153] : memref<16x128xf32, #tpu.memory_space<vmem>>, vector<1x128xf32>
    %380 = arith.addf %373, %379 : vector<1x128xf32>
    %c6_i32_154 = arith.constant 6 : i32
    %381 = arith.muli %347, %c6_i32_154 : i32
    %c4_i32_155 = arith.constant 4 : i32
    %382 = arith.addi %381, %c4_i32_155 : i32
    %383 = arith.index_cast %382 : i32 to index
    %384 = memref.load %arg2[%383] : memref<48xi32, #tpu.memory_space<smem>>
    %385 = arith.index_cast %384 : i32 to index
    %c0_156 = arith.constant 0 : index
    %386 = vector.load %arg4[%385, %c0_156] : memref<16x128xf32, #tpu.memory_space<vmem>>, vector<1x128xf32>
    %387 = arith.addf %380, %386 : vector<1x128xf32>
    %c6_i32_157 = arith.constant 6 : i32
    %388 = arith.muli %347, %c6_i32_157 : i32
    %c5_i32_158 = arith.constant 5 : i32
    %389 = arith.addi %388, %c5_i32_158 : i32
    %390 = arith.index_cast %389 : i32 to index
    %391 = memref.load %arg2[%390] : memref<48xi32, #tpu.memory_space<smem>>
    %392 = arith.index_cast %391 : i32 to index
    %c0_159 = arith.constant 0 : index
    %393 = vector.load %arg4[%392, %c0_159] : memref<16x128xf32, #tpu.memory_space<vmem>>, vector<1x128xf32>
    %394 = arith.addf %387, %393 : vector<1x128xf32>
    %395 = tpu.concatenate %8, %57, %106, %155, %204, %253, %302, %351 in 0 : vector<1x128xf32>, vector<1x128xf32>, vector<1x128xf32>, vector<1x128xf32>, vector<1x128xf32>, vector<1x128xf32>, vector<1x128xf32>, vector<1x128xf32> -> vector<8x128xf32>
    %396 = tpu.concatenate %51, %100, %149, %198, %247, %296, %345, %394 in 0 : vector<1x128xf32>, vector<1x128xf32>, vector<1x128xf32>, vector<1x128xf32>, vector<1x128xf32>, vector<1x128xf32>, vector<1x128xf32>, vector<1x128xf32> -> vector<8x128xf32>
    %397 = vector.extract_strided_slice %396 {offsets = [0, 49], sizes = [8, 1], strides = [1, 1]} : vector<8x128xf32> to vector<8x1xf32>
    %cst_160 = arith.constant 1.000000e+00 : f32
    %398 = vector.broadcast %cst_160 : f32 to vector<8x1xf32>
    %399 = arith.maximumf %397, %398 : vector<8x1xf32>
    %400 = tpu.reciprocal %399 : vector<8x1xf32> -> vector<8x1xf32>
    %401 = vector.broadcast %400 : vector<8x1xf32> to vector<8x128xf32>
    %402 = arith.mulf %396, %401 : vector<8x128xf32>
    %403 = arith.addf %395, %402 : vector<8x128xf32>
    %404 = arith.index_cast %2 : i32 to index
    %c0_161 = arith.constant 0 : index
    %405 = vector.load %arg8[%404, %c0_161] : memref<8x128xf32, #tpu.memory_space<vmem>>, vector<8x128xf32>
    tpu.vector_store %arg8[%404, %c0_161], %403 {strides = array<i32>} : memref<8x128xf32, #tpu.memory_space<vmem>>, vector<8x128xf32>,
    %c1_i32_162 = arith.constant 1 : i32
    %c0_163 = arith.constant 0 : index
    %c0_164 = arith.constant 0 : index
    %406 = vector.load %arg8[%c0_163, %c0_164] : memref<8x128xf32, #tpu.memory_space<vmem>>, vector<8x128xf32>
    %407 = vector.extract_strided_slice %406 {offsets = [0, 0], sizes = [8, 1], strides = [1, 1]} : vector<8x128xf32> to vector<8x1xf32>
    %cst_165 = arith.constant 0.000000e+00 : f32
    %408 = vector.broadcast %cst_165 : f32 to vector<8x128xf32>
    %409 = arith.maximumf %406, %408 : vector<8x128xf32>
    %c0_166 = arith.constant 0 : index
    %c0_167 = arith.constant 0 : index
    %410 = vector.load %arg5[%c0_166, %c0_167] : memref<128x128xf32, #tpu.memory_space<vmem>>, vector<128x128xf32>
    %cst_168 = arith.constant dense<0.000000e+00> : vector<8x128xf32>
    %411 = tpu.matmul %409, %410, %cst_168 {dimension_numbers = #tpu.dot_dimension_numbers<[1], [0], [0], [1], [0, 0, 1, 1], [], []>} : vector<8x128xf32>, vector<128x128xf32>, vector<8x128xf32> -> vector<8x128xf32>
    %c0_169 = arith.constant 0 : index
    %c0_170 = arith.constant 0 : index
    %412 = vector.load %arg6[%c0_169, %c0_170] : memref<1x128xf32, #tpu.memory_space<vmem>>, vector<1x128xf32>
    %413 = vector.broadcast %412 : vector<1x128xf32> to vector<8x128xf32>
    %414 = arith.addf %411, %413 : vector<8x128xf32>
    %415 = tpu.iota {dimensions = array<i32: 1>} : vector<8x128xi32>
    %c32_i32 = arith.constant 32 : i32
    %416 = vector.broadcast %c32_i32 : i32 to vector<8x128xi32>
    %417 = arith.cmpi eq, %415, %416 : vector<8x128xi32>
    %418 = vector.shape_cast %407 : vector<8x1xf32> to vector<8x1xf32>
    %419 = vector.broadcast %418 : vector<8x1xf32> to vector<8x128xf32>
    %420 = arith.select %417, %419, %414 : vector<8x128xi1>, vector<8x128xf32>
    %c0_171 = arith.constant 0 : index
    %c0_172 = arith.constant 0 : index
    %421 = vector.load %arg7[%c0_171, %c0_172] : memref<8x128xf32, #tpu.memory_space<vmem>>, vector<8x128xf32>
    tpu.vector_store %arg7[%c0_171, %c0_172], %420 {strides = array<i32>} : memref<8x128xf32, #tpu.memory_space<vmem>>, vector<8x128xf32>,
    return
  }
  func.func @transform_0(%arg0: i32, %arg1: memref<8xi32, #tpu.memory_space<smem>>, %arg2: memref<48xi32, #tpu.memory_space<smem>>) -> (i32, i32) {
    %c0_i32 = arith.constant 0 : i32
    %c0_i32_0 = arith.constant 0 : i32
    %c0_i32_1 = arith.constant 0 : i32
    return %c0_i32, %c0_i32_0 : i32, i32
  }
  func.func @transform_1(%arg0: i32, %arg1: memref<8xi32, #tpu.memory_space<smem>>, %arg2: memref<48xi32, #tpu.memory_space<smem>>) -> (i32, i32) {
    %c0_i32 = arith.constant 0 : i32
    %c0_i32_0 = arith.constant 0 : i32
    %c0_i32_1 = arith.constant 0 : i32
    return %c0_i32, %c0_i32_0 : i32, i32
  }
  func.func @transform_2(%arg0: i32, %arg1: memref<8xi32, #tpu.memory_space<smem>>, %arg2: memref<48xi32, #tpu.memory_space<smem>>) -> (i32, i32) {
    %c0_i32 = arith.constant 0 : i32
    %c0_i32_0 = arith.constant 0 : i32
    %c0_i32_1 = arith.constant 0 : i32
    return %c0_i32, %c0_i32_0 : i32, i32
  }
  func.func @transform_3(%arg0: i32, %arg1: memref<8xi32, #tpu.memory_space<smem>>, %arg2: memref<48xi32, #tpu.memory_space<smem>>) -> (i32, i32) {
    %c0_i32 = arith.constant 0 : i32
    %c0_i32_0 = arith.constant 0 : i32
    %c0_i32_1 = arith.constant 0 : i32
    return %c0_i32, %c0_i32_0 : i32, i32
  }
  func.func @transform_4(%arg0: i32, %arg1: memref<8xi32, #tpu.memory_space<smem>>, %arg2: memref<48xi32, #tpu.memory_space<smem>>) -> (i32, i32) {
    %c0_i32 = arith.constant 0 : i32
    %c0_i32_0 = arith.constant 0 : i32
    return %arg0, %c0_i32 : i32, i32
  }
}

</mosaic_0001>

<bundles_post_ra>
// kernel: tpu_custom_call.1
= control target key start
LH: loop header
LB: loop body
LE: loop exit
PB: predicated region body
PF: predicated region fallthrough
CT: control target
= control target key end

     0   :  { %s1148_s0 = inlined_call_operand.hbm [shape: s32[8], index: 0, kind: input, shape index: {}]   ;;  %s1149_s2 = inlined_call_operand.hbm [shape: f32[64,128], index: 2, kind: input, shape index: {}]   ;;  %s1150_s3 = inlined_call_operand.hbm [shape: f32[16,128], index: 3, kind: input, shape index: {}]   ;;  %s1151_s4 = inlined_call_operand.hbm [shape: f32[128,128], index: 4, kind: input, shape index: {}]   ;;  %s1152_s5 = inlined_call_operand.vmem [shape: f32[1,128], index: 5, kind: input, shape index: {}]   ;;  %s1153_s6 = inlined_call_operand.hbm [shape: f32[8,128], index: 6, kind: output, shape index: {}]   ;;  %s1154_s1 = inlined_call_operand.vmem [shape: s32[48], index: 1, kind: input, shape index: {}]  }
   0x1   :  { %s740_s23 = scalar_lea.hbm %s1148_s0, 16 }
   0x2   :  { %p741_p0 = scmp.ne.s32.totalorder %s1148_s0, %s740_s23  ;;  %p744_p1 = scmp.lt.u32.totalorder %s740_s23, %s1148_s0 }
   0x4   :  { %p746_p2 = pnand %p744_p1, %p741_p0 }
   0x6   :  { %749 = shalt.err (!%p746_p2)  }
   0x7   :  { %s858_s28 = smov [#allocation4]   ;;  %s13_s9 = sshll.u32 %s1154_s1, 4  ;;  %s14_s9 = int_to_ptr.vmem [resolvable:$true] %s13_s9 }
   0x8   :  { %12 = dma.hbm_to_smem %s1148_s0, 16, %s858_s28, [#allocation3] }
   0x9   :  { %s750_s10 = scalar_lea.vmem %s14_s9, 16  ;;  %p755_p4 = scmp.lt.s32.totalorder %s14_s9, %s14_s9 }
   0xa   :  { %p751_p3 = scmp.ne.s32.totalorder %s14_s9, %s750_s10  ;;  %p756_p5 = scmp.lt.s32.totalorder %s750_s10, %s750_s10 }
   0xc   :  { %p757_p6 = por %p756_p5, %p755_p4 }
   0xe   :  { %p758_p7 = pnand %p757_p6, %p751_p3 }
  0x10   :  { %761 = shalt.err (!%p758_p7)  }
  0x11   :  { %s859_s11 = smov [#allocation5]  }
  0x12   :  { %16 = dma.vmem_to_smem %s14_s9, 16, %s859_s11, [#allocation3] }
  0x13   :  { %850 = dma.done.wait [#allocation3], 32 }
  0x14   :  { %851 = vsyncadd [#allocation3], 4294967264 }
  0x15   :  { %18 = sfence }
  0x16   :  { %19 = vsyncpa [#allocation7], 0 }
  0x17   :  { %20 = vsyncpa [#allocation10], 0 }
  0x18   :  { %21 = vsyncpa [#allocation8], 0  ;;  %s860_s0 = smov [#allocation9]   ;;  %s861_s13 = smov [#allocation6]  }
  0x19   :  { %s39_s12 = sshll.u32 %s860_s0, 4  ;;  %s27_s1 = sshll.u32 %s861_s13, 4  ;;  %s40_s12 = int_to_ptr.vmem [resolvable:$true] %s39_s12  ;;  %s921_s1 = int_to_ptr.vmem [resolvable:$true] %s27_s1 }
  0x1a   :  { %s762_s16 = scalar_lea.hbm %s1150_s3, 256 }
  0x1b   :  { %p763_p8 = scmp.ne.s32.totalorder %s1150_s3, %s762_s16  ;;  %p766_p9 = scmp.lt.u32.totalorder %s762_s16, %s1150_s3 }
  0x1d   :  { %p768_p10 = pnand %p766_p9, %p763_p8 }
  0x1f   :  { %771 = shalt.err (!%p768_p10)
}
  0x20   :  { %s772_s21 = scalar_lea.vmem %s40_s12, 256  ;;  %p777_p12 = scmp.lt.s32.totalorder %s40_s12, %s40_s12 }
  0x21   :  { %p773_p11 = scmp.ne.s32.totalorder %s40_s12, %s772_s21  ;;  %p778_p13 = scmp.lt.s32.totalorder %s772_s21, %s772_s21 }
  0x23   :  { %p779_p0 = por %p778_p13, %p777_p12 }
  0x25   :  { %p780_p1 = pnand %p779_p0, %p773_p11 }
  0x27   :  { %783 = shalt.err (!%p780_p1)
}
  0x28   :  { %s862_s22 = smov 128   ;;  %s863_s23 = smov 8  }
  0x29   :  { %45 = dma.hbm_to_vmem [thread:$0]  %s1150_s3, 256, %s40_s12, [#allocation10], %s862_s22, %s862_s22, %s863_s23  }
  0x2a   :  { %s784_s28 = scalar_lea.hbm %s1149_s2, 1024 }
  0x2b   :  { %p785_p2 = scmp.ne.s32.totalorder %s1149_s2, %s784_s28  ;;  %p788_p3 = scmp.lt.u32.totalorder %s784_s28, %s1149_s2 }
  0x2d   :  { %p790_p4 = pnand %p788_p3, %p785_p2 }
  0x2f   :  { %793 = shalt.err (!%p790_p4)
}
  0x30   :  { %s794_s9 = scalar_lea.vmem %s921_s1, 1024  ;;  %p799_p6 = scmp.lt.s32.totalorder %s921_s1, %s921_s1 }
  0x31   :  { %p795_p5 = scmp.ne.s32.totalorder %s921_s1, %s794_s9  ;;  %p800_p7 = scmp.lt.s32.totalorder %s794_s9, %s794_s9 }
  0x33   :  { %p801_p8 = por %p800_p7, %p799_p6 }
  0x35   :  { %p802_p9 = pnand %p801_p8, %p795_p5 }
  0x37   :  { %805 = shalt.err (!%p802_p9)
}
  0x38   :  { %33 = dma.hbm_to_vmem [thread:$0]  %s1149_s2, 1024, %s921_s1, [#allocation7], %s862_s22, %s862_s22, %s863_s23  }
  0x39   :  { %s864_s11 = smov [#allocation11]   ;;  %s806_s14 = scalar_lea.hbm %s1151_s4, 2048 }
  0x3a   :  { %s51_s0 = sshll.u32 %s864_s11, 4  ;;  %p807_p10 = scmp.ne.s32.totalorder %s1151_s4, %s806_s14  ;;  %s52_s0 = int_to_ptr.vmem [resolvable:$true] %s51_s0 }
  0x3b   :  { %p810_p11 = scmp.lt.u32.totalorder %s806_s14, %s1151_s4 }
  0x3d   :  { %p812_p12 = pnand %p810_p11, %p807_p10 }
  0x3f   :  { %815 = shalt.err (!%p812_p12)
}
  0x40   :  { %s816_s19 = scalar_lea.vmem %s52_s0, 2048  ;;  %p821_p0 = scmp.lt.s32.totalorder %s52_s0, %s52_s0 }
  0x41   :  { %p817_p13 = scmp.ne.s32.totalorder %s52_s0, %s816_s19  ;;  %p822_p1 = scmp.lt.s32.totalorder %s816_s19, %s816_s19 }
  0x43   :  { %p823_p2 = por %p822_p1, %p821_p0 }
  0x45   :  { %p824_p3 = pnand %p823_p2, %p817_p13 }
  0x47   :  { %827 = shalt.err (!%p824_p3)
}
  0x48   :  { %57 = dma.hbm_to_vmem [thread:$0]  %s1151_s4, 2048, %s52_s0, [#allocation10], %s862_s22, %s862_s22, %s863_s23  }
  0x49   :  { %852 = dma.done.wait [#allocation7], 1024  }
  0x4a   :  { %853 = vsyncadd [#allocation7], 4294966272 }
  0x4b   :  { %854 = dma.done.wait [#allocation10], 2304  }
  0x4c   :  { %855 = vsyncadd [#allocation10], 4294964992  ;;  %v865_v0 = vmov 49   ;;  %s973_s20 = sld [smem:[#allocation5]]  ;;  %s975_s21 = sld [smem:[#allocation5 + $0x1]]  ;;  %v866_v1 = vmov 0.0|0.0  }
  0x4d   :  { %736 = vset.pattern.permute.xlu0 %v865_v0  ;;  %s977_s24 = sld [smem:[#allocation5 + $0x2]]  ;;  %s979_s25 = sld [smem:[#allocation5 + $0x3]]  ;;  %699 = vmatprep.subr.bf16.mxu0 %v866_v1  ;;  %v417_v2 = vld [vmem:[#allocation11] sm:$0xff]  ;;  %v418_v3 = vld [vmem:[#allocation11 + $0x8] sm:$0xff]  ;;  %v419_v5 = vld [vmem:[#allocation11 + $0x10] sm:$0xff]  ;;  %vm363_vm0 = vcmask 1040384  }
  0x4e   :  { %s981_s26 = sld [smem:[#allocation5 + $0x4]]  ;;  %s983_s27 = sld [smem:[#allocation5 + $0x5]]  ;;  %v700_v4 = vpack.c.bf16 %v418_v3, %v417_v2  ;;  %v420_v8 = vld [vmem:[#allocation11 + $0x18] sm:$0xff]  ;;  %v421_v9 = vld [vmem:[#allocation11 + $0x20] sm:$0xff]  ;;  %v422_v11 = vld [vmem:[#allocation11 + $0x28] sm:$0xff]  ;;  %vm365_vm1 = vcmask 1041408  }
  0x4f   :  { %s598_s28 = sld [smem:[#allocation5 + $0x6]]  ;;  %s599_s4 = sld [smem:[#allocation5 + $0x7]]  ;;  %v703_v10 = vpack.c.bf16 %v420_v8, %v419_v5  ;;  %v706_v12 = vpack.c.bf16 %v422_v11, %v421_v9  ;;  %v423_v14 = vld [vmem:[#allocation11 + $0x30] sm:$0xff]  ;;  %v424_v15 = vld [vmem:[#allocation11 + $0x38] sm:$0xff]  ;;  %v425_v23 = vld [vmem:[#allocation11 + $0x40] sm:$0xff]  ;;  %vm367_vm2 = vcmask 1042432  }
  0x50   :  { %s986_s22 = sld [smem:[#allocation5 + $0x8]]  ;;  %s988_s23 = sld [smem:[#allocation5 + $0x9]]  ;;  %701 = vmatpush3.bf16.msra.mxu0 %v700_v4  ;;  %v709_v21 = vpack.c.bf16 %v424_v15, %v423_v14  ;;  %v426_v24 = vld [vmem:[#allocation11 + $0x48] sm:$0xff]  ;;  %v427_v36 = vld [vmem:[#allocation11 + $0x50] sm:$0xff]  ;;  %v428_v37 = vld [vmem:[#allocation11 + $0x58] sm:$0xff]  ;;  %vm369_vm3 = vcmask 1043456  }
  0x51   :  { %s990_s29 = sld [smem:[#allocation5 + $0xa]]  ;;  %s992_s30 = sld [smem:[#allocation5 + $0xb]]  ;;  %702 = vmatprep.subr.bf16.mxu0 %v866_v1  ;;  %v712_v33 = vpack.c.bf16 %v426_v24, %v425_v23  ;;  %v715_v44 = vpack.c.bf16 %v428_v37, %v427_v36  ;;  %v429_v47 = vld [vmem:[#allocation11 + $0x60] sm:$0xff]  ;;  %v430_v48 = vld [vmem:[#allocation11 + $0x68] sm:$0xff]  ;;  %vm371_vm4 = vcmask 1044480   ;;  %vm373_vm5 = vcmask 1045504  }
  0x52   :  { %s605_s9 = sld [smem:[#allocation5 + $0xc]]  ;;  %s995_s3 = sld [smem:[#allocation5 + $0xd]]  ;;  %v718_v56 = vpack.c.bf16 %v430_v48, %v429_v47  ;;  %vm375_vm6 = vcmask 1046528   ;;  %vm868_vm7 = vmmov 0  }
  0x53   :  { %s997_s10 = sld [smem:[#allocation5 + $0xe]]  ;;  %s999_s11 = sld [smem:[#allocation5 + $0xf]] }
  0x54   :  { %s1001_s0 = sld [smem:[#allocation5 + $0x10]]  ;;  %s1003_s12 = sld [smem:[#allocation5 + $0x11]]  ;;  %704 = vmatpush3.bf16.msra.mxu0 %v703_v10 }
  0x55   :  { %s110_s7 = scalar_lea.vmem [#allocation9], %s598_s28  ;;  %s115_s8 = scalar_lea.vmem [#allocation9], %s599_s4  ;;  %705 = vmatprep.subr.bf16.mxu0 %v866_v1 }
  0x56   :  { %v111_v6 = vld [vmem:[%s110_s7] sm:$0x1]  ;;  %s1005_s13 = sld [smem:[#allocation5 + $0x12]]  ;;  %s1007_s14 = sld [smem:[#allocation5 + $0x13]] }
  0x57   :  { %v116_v7 = vld [vmem:[%s115_s8] sm:$0x1]  ;;  %s1009_s15 = sld [smem:[#allocation5 + $0x14]]  ;;  %s1011_s16 = sld [smem:[#allocation5 + $0x15]] }
  0x58   :  { %v117_v13 = vadd.f32 %v116_v7, %v111_v6  ;;  %s1013_s17 = sld [smem:[#allocation5 + $0x16]]  ;;  %s76_s18 = scalar_lea.vmem [#allocation9], %s973_s20  ;;  %707 = vmatpush3.bf16.msra.mxu0 %v706_v12 }
  0x59   :  { %v77_v16 = vld [vmem:[%s76_s18] sm:$0x1]  ;;  %s120_s19 = scalar_lea.vmem [#allocation9], %s986_s22  ;;  %s81_s2 = scalar_lea.vmem [#allocation9], %s975_s21  ;;  %708 = vmatprep.subr.bf16.mxu0 %v866_v1 }
  0x5a   :  { %v121_v17 = vld [vmem:[%s120_s19] sm:$0x1]  ;;  %s144_s1 = scalar_lea.vmem [#allocation9], %s605_s9  ;;  %s149_s28 = scalar_lea.vmem [#allocation9], %s995_s3 }
  0x5b   :  { %v82_v18 = vld [vmem:[%s81_s2] sm:$0x1]  ;;  %s1020_s4 = sld [smem:[#allocation5 + $0x17]]  ;;  %v122_v22 = vadd.f32 %v121_v17, %v117_v13  ;;  %s125_s20 = scalar_lea.vmem [#allocation9], %s988_s23 }
  0x5c   :  { %v145_v19 = vld [vmem:[%s144_s1] sm:$0x1]  ;;  %s178_s21 = scalar_lea.vmem [#allocation9], %s1005_s13  ;;  %v83_v28 = vadd.f32 %v82_v18, %v77_v16  ;;  %s154_s22 = scalar_lea.vmem [#allocation9], %s997_s10  ;;  %710 = vmatpush3.bf16.msra.mxu0 %v709_v21 }
  0x5d   :  { %v150_v20 = vld [vmem:[%s149_s28] sm:$0x1]  ;;  %s183_s7 = scalar_lea.vmem [#allocation9], %s1007_s14  ;;  %s86_s8 = scalar_lea.vmem [#allocation9], %s977_s24  ;;  %711 = vmatprep.subr.bf16.mxu0 %v866_v1 }
  0x5e   :  { %v126_v25 = vld [vmem:[%s125_s20] sm:$0x1]  ;;  %v151_v26 = vadd.f32 %v150_v20, %v145_v19  ;;  %s130_s9 = scalar_lea.vmem [#allocation9], %s990_s29  ;;  %s1029_s23 = sld [smem:[#allocation5 + $0x18]] }
  0x5f   :  { %v179_v27 = vld [vmem:[%s178_s21] sm:$0x1]  ;;  %v127_v34 = vadd.f32 %v126_v25, %v122_v22  ;;  %s1031_s3 = sld [smem:[#allocation5 + $0x19]]  ;;  %s91_s10 = scalar_lea.vmem [#allocation9], %s979_s25 }
  0x60   :  { %v155_v29 = vld [vmem:[%s154_s22] sm:$0x1]  ;;  %s188_s24 = scalar_lea.vmem [#allocation9], %s1009_s15  ;;  %s1036_s29 = sld [smem:[#allocation5 + $0x1a]]  ;;  %713 = vmatpush3.bf16.msra.mxu0 %v712_v33 }
  0x61   :  { %v184_v30 = vld [vmem:[%s183_s7] sm:$0x1]  ;;  %v156_v39 = vadd.f32 %v155_v29, %v151_v26  ;;  %s1038_s13 = sld [smem:[#allocation5 + $0x1b]]  ;;  %s159_s14 = scalar_lea.vmem [#allocation9], %s999_s11  ;;  %714 = vmatprep.subr.bf16.mxu0 %v866_v1 }
  0x62   :  { %v87_v31 = vld [vmem:[%s86_s8] sm:$0x1]  ;;  %v185_v35 = vadd.f32 %v184_v30, %v179_v27  ;;  %s1041_s18 = sld [smem:[#allocation5 + $0x1c]]  ;;  %s1043_s19 = sld [smem:[#allocation5 + $0x1d]] }
  0x63   :  { %v131_v32 = vld [vmem:[%s130_s9] sm:$0x1]  ;;  %v88_v41 = vadd.f32 %v87_v31, %v83_v28  ;;  %s135_s2 = scalar_lea.vmem [#allocation9], %s992_s30  ;;  %s1046_s1 = sld [smem:[#allocation5 + $0x1e]] }
  0x64   :  { %v92_v38 = vld [vmem:[%s91_s10] sm:$0x1]  ;;  %s1048_s25 = sld [smem:[#allocation5 + $0x1f]]  ;;  %v132_v45 = vadd.f32 %v131_v32, %v127_v34  ;;  %s1050_s11 = sld [smem:[#allocation5 + $0x20]]  ;;  %716 = vmatpush3.bf16.msra.mxu0 %v715_v44 }
  0x65   :  { %v189_v40 = vld [vmem:[%s188_s24] sm:$0x1]  ;;  %s1052_s15 = sld [smem:[#allocation5 + $0x21]]  ;;  %s193_s30 = scalar_lea.vmem [#allocation9], %s1011_s16  ;;  %v93_v51 = vadd.f32 %v92_v38, %v88_v41  ;;  %717 = vmatprep.subr.bf16.mxu0 %v866_v1 }
  0x66   :  { %v160_v42 = vld [vmem:[%s159_s14] sm:$0x1]  ;;  %v190_v46 = vadd.f32 %v189_v40, %v185_v35  ;;  %s1056_s28 = sld [smem:[#allocation5 + $0x22]]  ;;  %s1058_s20 = sld [smem:[#allocation5 + $0x23]] }
  0x67   :  { %v136_v43 = vld [vmem:[%s135_s2] sm:$0x1]  ;;  %v161_v49 = vadd.f32 %v160_v42, %v156_v39  ;;  %s96_s21 = scalar_lea.vmem [#allocation9], %s981_s26  ;;  %s164_s22 = scalar_lea.vmem [#allocation9], %s1001_s0 }
  0x68   :  { %v194_v50 = vld [vmem:[%s193_s30] sm:$0x1]  ;;  %s212_s7 = scalar_lea.vmem [#allocation9], %s1029_s23  ;;  %s217_s8 = scalar_lea.vmem [#allocation9], %s1031_s3  ;;  %v1064_v57 = vadd.f32 %v136_v43, %v132_v45  ;;  %719 = vmatpush3.bf16.msra.mxu0 %v718_v56 }
  0x69   :  { %v97_v52 = vld [vmem:[%s96_s21] sm:$0x1]  ;;  %s169_s16 = scalar_lea.vmem [#allocation9], %s1003_s12  ;;  %v195_v59 = vadd.f32 %v194_v50, %v190_v46  ;;  %s222_s26 = scalar_lea.vmem [#allocation9], %s1036_s29  ;;  %720 = vmatprep.subr.bf16.mxu0 %v866_v1 }
  0x6a   :  { %v165_v53 = vld [vmem:[%s164_s22] sm:$0x1]  ;;  %s101_s0 = scalar_lea.vmem [#allocation9], %s983_s27  ;;  %s198_s9 = scalar_lea.vmem [#allocation9], %s1013_s17  ;;  %v98_v3 = vadd.f32 %v97_v52, %v93_v51  ;;  %v378_v13 = vrot.slane %v1064_v57, 7 }
  0x6b   :  { %v213_v54 = vld [vmem:[%s212_s7] sm:$0x1]  ;;  %v166_v63 = vadd.f32 %v165_v53, %v161_v49  ;;  %s227_s23 = scalar_lea.vmem [#allocation9], %s1038_s13  ;;  %s246_s12 = scalar_lea.vmem [#allocation9], %s1046_s1 }
  0x6c   :  { %v218_v55 = vld [vmem:[%s217_s8] sm:$0x1]  ;;  %s251_s3 = scalar_lea.vmem [#allocation9], %s1048_s25  ;;  %s232_s10 = scalar_lea.vmem [#allocation9], %s1041_s18 }
  0x6d   :  { %v170_v58 = vld [vmem:[%s169_s16] sm:$0x1]  ;;  %v219_v60 = vadd.f32 %v218_v55, %v213_v54  ;;  %s256_s24 = scalar_lea.vmem [#allocation9], %s1050_s11  ;;  %s261_s27 = scalar_lea.vmem [#allocation9], %s1052_s15 }
  0x6e   :  { %v223_v61 = vld [vmem:[%s222_s26] sm:$0x1]  ;;  %s1077_s17 = sld [smem:[#allocation5 + $0x24]]  ;;  %v171_v14 = vadd.f32 %v170_v58, %v166_v63  ;;  %s203_s29 = scalar_lea.vmem [#allocation9], %s1020_s4 }
  0x6f   :  { %v102_v62 = vld [vmem:[%s101_s0] sm:$0x1]  ;;  %v224_v4 = vadd.f32 %v223_v61, %v219_v60  ;;  %s1082_s13 = sld [smem:[#allocation5 + $0x25]]  ;;  %s1084_s14 = sld [smem:[#allocation5 + $0x26]] }
  0x70   :  { %v199_v0 = vld [vmem:[%s198_s9] sm:$0x1]  ;;  %v103_v17 = vadd.f32 %v102_v62, %v98_v3  ;;  %s237_s18 = scalar_lea.vmem [#allocation9], %s1043_s19  ;;  %s1087_s2 = sld [smem:[#allocation5 + $0x27]]  ;;  %v381_v23 = vrot.slane %v171_v14, 6 }
  0x71   :  { %v228_v2 = vld [vmem:[%s227_s23] sm:$0x1]  ;;  %v200_v10 = vadd.f32 %v199_v0, %v195_v59  ;;  %s1089_s1 = sld [smem:[#allocation5 + $0x28]]  ;;  %s266_s25 = scalar_lea.vmem [#allocation9], %s1056_s28 }
  0x72   :  { %v247_v5 = vld [vmem:[%s246_s12] sm:$0x1]  ;;  %v229_v11 = vadd.f32 %v228_v2, %v224_v4  ;;  %s1092_s4 = sld [smem:[#allocation5 + $0x29]]  ;;  %s1094_s11 = sld [smem:[#allocation5 + $0x2a]]  ;;  %v398_v25 = vsel %vm363_vm0, %v103_v17, %v378_v13 }
  0x73   :  { %v252_v6 = vld [vmem:[%s251_s3] sm:$0x1]  ;;  %s1096_s15 = sld [smem:[#allocation5 + $0x2b]]  ;;  %s1098_s19 = sld [smem:[#allocation5 + $0x2c]]  ;;  %v399_v33 = vsel %vm365_vm1, %v398_v25, %v381_v23  ;;  %v869_v25 = vmov 0.0  }
  0x74   :  { %v233_v7 = vld [vmem:[%s232_s10] sm:$0x1]  ;;  %v253_v8 = vadd.f32 %v252_v6, %v247_v5  ;;  %s1100_s30 = sld [smem:[#allocation5 + $0x2d]]  ;;  %s1102_s21 = sld [smem:[#allocation5 + $0x2e]]  ;;  %696 = vmatprep.mubr.msk.f32.mxu0 %vm868_vm7, %v869_v25 }
  0x75   :  { %v257_v9 = vld [vmem:[%s256_s24] sm:$0x1]  ;;  %v234_v18 = vadd.f32 %v233_v7, %v229_v11  ;;  %s1104_s28 = sld [smem:[#allocation5 + $0x2f]]  ;;  %s271_s22 = scalar_lea.vmem [#allocation9], %s1058_s20 }
  0x76   :  { %v262_v12 = vld [vmem:[%s261_s27] sm:$0x1]  ;;  %v258_v16 = vadd.f32 %v257_v9, %v253_v8  ;;  %s280_s7 = scalar_lea.vmem [#allocation9], %s1077_s17  ;;  %s285_s8 = scalar_lea.vmem [#allocation9], %s1082_s13 }
  0x77   :  { %v204_v15 = vld [vmem:[%s203_s29] sm:$0x1]  ;;  %s290_s16 = scalar_lea.vmem [#allocation9], %s1084_s14  ;;  %s295_s20 = scalar_lea.vmem [#allocation9], %s1087_s2 }
  0x78   :  { %v238_v19 = vld [vmem:[%s237_s18] sm:$0x1]  ;;  %v263_v20 = vadd.f32 %v262_v12, %v258_v16  ;;  %v205_v21 = vadd.f32 %v204_v15, %v200_v10  ;;  %s314_s26 = scalar_lea.vmem [#allocation9], %s1094_s11  ;;  %s300_s23 = scalar_lea.vmem [#allocation9], %s1089_s1 }
  0x79   :  { %v267_v1 = vld [vmem:[%s266_s25] sm:$0x1]  ;;  %v239_v22 = vadd.f32 %v238_v19, %v234_v18  ;;  %s319_s0 = scalar_lea.vmem [#allocation9], %s1096_s15  ;;  %s324_s9 = scalar_lea.vmem [#allocation9], %s1098_s19 }
  0x7a   :  { %v268_v24 = vadd.f32 %v267_v1, %v263_v20  ;;  %v272_v26 = vld [vmem:[%s271_s22] sm:$0x1]  ;;  %v384_v30 = vrot.slane %v205_v21, 5  ;;  %s329_s12 = scalar_lea.vmem [#allocation9], %s1100_s30  ;;  %s305_s3 = scalar_lea.vmem [#allocation9], %s1092_s4  ;;  %v432_v21 = vld [vmem:[#allocation11 + $0x78] sm:$0xff] }
  0x7b   :  { %v281_v27 = vld [vmem:[%s280_s7] sm:$0x1]  ;;  %v387_v32 = vrot.slane %v239_v22, 4  ;;  %s334_s10 = scalar_lea.vmem [#allocation9], %s1102_s21  ;;  %s597_s24 = sld [smem:[#allocation4 + $0x1]] }
  0x7c   :  { %v286_v28 = vld [vmem:[%s285_s8] sm:$0x1]  ;;  %v273_v34 = vadd.f32 %v272_v26, %v268_v24  ;;  %v400_v42 = vsel %vm367_vm2, %v399_v33, %v384_v30  ;;  %s604_s27 = sld [smem:[#allocation4 + $0x2]]  ;;  %s339_s17 = scalar_lea.vmem [#allocation9], %s1104_s28  ;;  %v867_v24 = vmov 0   ;;  %v510_v30 = vlaneseq }
  0x7d   :  { %v291_v29 = vld [vmem:[%s290_s16] sm:$0x1]  ;;  %v287_v31 = vadd.f32 %v286_v28, %v281_v27  ;;  %v401_v50 = vsel %vm369_vm3, %v400_v42, %v387_v32  ;;  %s611_s29 = sld [smem:[#allocation4 + $0x3]]  ;;  %s618_s13 = sld [smem:[#allocation4 + $0x4]] }
  0x7e   :  { %v296_v35 = vld [vmem:[%s295_s20] sm:$0x1]  ;;  %v390_v47 = vrot.slane %v273_v34, 3  ;;  %s625_s14 = sld [smem:[#allocation4 + $0x5]]  ;;  %s632_s18 = sld [smem:[#allocation4 + $0x6]] }
  0x7f   :  { %v315_v36 = vld [vmem:[%s314_s26] sm:$0x1]  ;;  %v292_v37 = vadd.f32 %v291_v29, %v287_v31  ;;  %s639_s2 = sld [smem:[#allocation4 + $0x7]]  ;;  %s71_s1 = sld [smem:[#allocation4]]  ;;  %v511_v31 = vand.u32 127, %v510_v30 }
  0x80   :  { %v320_v38 = vld [vmem:[%s319_s0] sm:$0x1]  ;;  %v402_v55 = vsel %vm371_vm4, %v401_v50, %v390_v47  ;;  %s870_s8 = smov [#allocation12]  }
  0x81   :  { %v325_v39 = vld [vmem:[%s324_s9] sm:$0x1]  ;;  %v321_v41 = vadd.f32 %v320_v38, %v315_v36  ;;  %v297_v43 = vadd.f32 %v296_v35, %v292_v37  ;;  %s106_s25 = scalar_lea.vmem [#allocation6], %s597_s24  ;;  %s526_s16 = sshll.u32 %s870_s8, 4  ;;  %vm512_vm8 = vcmp.eq.s32.totalorder %v511_v31, 32  ;;  %s527_s16 = int_to_ptr.vmem [resolvable:$true] %s526_s16 }
  0x82   :  { %v301_v40 = vld [vmem:[%s300_s23] sm:$0x1]  ;;  %s140_s4 = scalar_lea.vmem [#allocation6], %s604_s27  ;;  %s828_s20 = scalar_lea.vmem %s527_s16, 128 }
  0x83   :  { %v330_v44 = vld [vmem:[%s329_s12] sm:$0x1]  ;;  %v326_v46 = vadd.f32 %v325_v39, %v321_v41  ;;  %v302_v48 = vadd.f32 %v301_v40, %v297_v43  ;;  %s174_s11 = scalar_lea.vmem [#allocation6], %s611_s29  ;;  %s208_s15 = scalar_lea.vmem [#allocation6], %s618_s13 }
  0x84   :  { %v306_v45 = vld [vmem:[%s305_s3] sm:$0x1]  ;;  %s242_s19 = scalar_lea.vmem [#allocation6], %s625_s14  ;;  %s276_s30 = scalar_lea.vmem [#allocation6], %s632_s18 }
  0x85   :  { %v335_v49 = vld [vmem:[%s334_s10] sm:$0x1]  ;;  %v331_v51 = vadd.f32 %v330_v44, %v326_v46  ;;  %v307_v52 = vadd.f32 %v306_v45, %v302_v48  ;;  %s310_s21 = scalar_lea.vmem [#allocation6], %s639_s2  ;;  %s72_s28 = scalar_lea.vmem [#allocation6], %s71_s1 }
  0x86   :  { %v340_v53 = vld [vmem:[%s339_s17] sm:$0x1]  ;;  %p829_p4 = scmp.ne.s32.totalorder %s527_s16, %s828_s20  ;;  %p833_p5 = scmp.lt.s32.totalorder %s527_s16, %s527_s16 }
  0x87   :  { %v336_v54 = vadd.f32 %v335_v49, %v331_v51  ;;  %v393_v56 = vrot.slane %v307_v52, 2  ;;  %v107_v62 = vld [vmem:[%s106_s25] sm:$0x1]  ;;  %p834_p6 = scmp.lt.s32.totalorder %s828_s20, %s828_s20 }
  0x88   :  { %v141_v63 = vld [vmem:[%s140_s4] sm:$0x1]  ;;  %v343_v3 = vrot.slane %v107_v62, 7 }
  0x89   :  { %v341_v57 = vadd.f32 %v340_v53, %v336_v54  ;;  %v403_v58 = vsel %vm373_vm5, %v402_v55, %v393_v56  ;;  %v175_v0 = vld [vmem:[%s174_s11] sm:$0x1]  ;;  %v346_v5 = vrot.slane %v141_v63, 6  ;;  %p835_p7 = por %p834_p6, %p833_p5 }
  0x8a   :  { %v209_v2 = vld [vmem:[%s208_s15] sm:$0x1]  ;;  %v349_v7 = vrot.slane %v175_v0, 5 }
  0x8b   :  { %v396_v59 = vrot.slane %v341_v57, 1  ;;  %v243_v4 = vld [vmem:[%s242_s19] sm:$0x1]  ;;  %v352_v9 = vrot.slane %v209_v2, 4  ;;  %p836_p8 = pnand %p835_p7, %p829_p4 }
  0x8c   :  { %v277_v6 = vld [vmem:[%s276_s30] sm:$0x1]  ;;  %v355_v11 = vrot.slane %v243_v4, 3 }
  0x8d   :  { %v404_v60 = vsel %vm375_vm6, %v403_v58, %v396_v59  ;;  %v311_v8 = vld [vmem:[%s310_s21] sm:$0x1]  ;;  %v358_v13 = vrot.slane %v277_v6, 2 }
  0x8e   :  { %v405_v61 = vmax.f32 %v404_v60, 1.0  ;;  %v73_v10 = vld [vmem:[%s72_s28] sm:$0x1]  ;;  %v361_v15 = vrot.slane %v311_v8, 1 }
  0x8f   :  { %v364_v12 = vsel %vm363_vm0, %v73_v10, %v343_v3  ;;  %v431_v1 = vld [vmem:[#allocation11 + $0x70] sm:$0xff] }
  0x90   :  { %738 = vrcp.f32 %v405_v61  ;;  %v366_v14 = vsel %vm365_vm1, %v364_v12, %v346_v5  ;;  %v721_v23 = vpack.c.bf16 %v432_v21, %v431_v1  ;;  %v646_v32 = vld [vmem:[%s1152_s5] ss:$0 sm:$0xff] }
  0x91   :  { %v368_v16 = vsel %vm367_vm2, %v366_v14, %v349_v7 }
  0x92   :  { %v370_v17 = vsel %vm369_vm3, %v368_v16, %v352_v9  ;;  %722 = vmatpush3.bf16.msra.mxu0 %v721_v23 }
  0x93   :  { %v372_v19 = vsel %vm371_vm4, %v370_v17, %v355_v11 }
  0x94   :  { %v374_v20 = vsel %vm373_vm5, %v372_v19, %v358_v13 }
  0x95   :  { %v376_v22 = vsel %vm375_vm6, %v374_v20, %v361_v15 }
  0x9a   :  { %v739_v18 = vpop.eup %738 }
  0x9b   :  { %409 = vperm.xlu0 %736, %v739_v18  }
  0x9f   :  { %737 = vset.pattern.permute.xlu0 %v867_v24 }
 0x11a   :  { %v410_v26 = vpop.permute.xlu0 %409 }
 0x11b   :  { %v412_v27 = vmul.f32 %v410_v26, %v404_v60 }
 0x11d   :  { %v413_v28 = vadd.f32 %v412_v27, %v376_v22 }
 0x11f   :  { %515 = vperm.xlu0 %737, %v413_v28   ;;  %v416_v29 = vmax.f32 %v413_v28, 0.0 }
 0x121   :  { %697 = vmatmul.mubr.f32.vlgmr.msra.gmra.mrb[0].mxu0 %v416_v29 }
 0x19e   :  { %v516_v36 = vpop.permute.xlu0 %515 }
 0x1f4   :  { %v506_v33 = vpop.f32.mrb[0].mxu0 }
 0x1f5   :  { %v507_v34 = vadd.f32 %v646_v32, %v506_v33  ;;  %v698_v35 = vpop.f32.mrb[1].mxu0 }
 0x1f7   :  { %v518_v37 = vsel %vm512_vm8, %v516_v36, %v507_v34 }
 0x1f8   :  { %519 = vst [vmem:[#allocation12] sm:$0xff] %v518_v37 }
 0x1f9   :  { %839 = shalt.err (!%p836_p8)
}
 0x1fa   :  { %s840_s5 = scalar_lea.hbm %s1153_s6, 128 }
 0x1fb   :  { %p841_p9 = scmp.ne.s32.totalorder %s1153_s6, %s840_s5  ;;  %p844_p10 = scmp.lt.u32.totalorder %s840_s5, %s1153_s6 }
 0x1fd   :  { %p846_p11 = pnand %p844_p10, %p841_p9 }
 0x1ff   :  { %849 = shalt.err (!%p846_p11)
}
 0x200   :  { %529 = dma.vmem_to_hbm [thread:$0]  %s527_s16, 128, %s1153_s6, [#allocation8]  }
 0x201   :  { %856 = dma.done.wait [#allocation8], 128  }
 0x202   :  { %857 = vsyncadd [#allocation8], 4294967168 }
 0x203   :  { %533 = vsyncpa [#allocation7], 1 }
 0x204   :  { %534 = vsyncpa [#allocation10], 1 }
 0x205   :  { %535 = vsyncpa [#allocation8], 1 }

// kernel: tpu_custom_call.1
= control target key start
LH: loop header
LB: loop body
LE: loop exit
PB: predicated region body
PF: predicated region fallthrough
CT: control target
= control target key end

     0   :  { %s1148_s0 = inlined_call_operand.hbm [shape: s32[8], index: 0, kind: input, shape index: {}]   ;;  %s1149_s2 = inlined_call_operand.hbm [shape: f32[64,128], index: 2, kind: input, shape index: {}]   ;;  %s1150_s3 = inlined_call_operand.hbm [shape: f32[16,128], index: 3, kind: input, shape index: {}]   ;;  %s1151_s4 = inlined_call_operand.hbm [shape: f32[128,128], index: 4, kind: input, shape index: {}]   ;;  %s1152_s5 = inlined_call_operand.vmem [shape: f32[1,128], index: 5, kind: input, shape index: {}]   ;;  %s1153_s6 = inlined_call_operand.hbm [shape: f32[8,128], index: 6, kind: output, shape index: {}]   ;;  %s1154_s1 = inlined_call_operand.vmem [shape: s32[48], index: 1, kind: input, shape index: {}]  }
   0x1   :  { %s740_s23 = scalar_lea.hbm %s1148_s0, 16 }
   0x2   :  { %p741_p0 = scmp.ne.s32.totalorder %s1148_s0, %s740_s23  ;;  %p744_p1 = scmp.lt.u32.totalorder %s740_s23, %s1148_s0 }
   0x4   :  { %p746_p2 = pnand %p744_p1, %p741_p0 }
   0x6   :  { %749 = shalt.err (!%p746_p2)  }
   0x7   :  { %s858_s28 = smov [#allocation4]   ;;  %s13_s9 = sshll.u32 %s1154_s1, 4  ;;  %s14_s9 = int_to_ptr.vmem [resolvable:$true] %s13_s9 }
   0x8   :  { %12 = dma.hbm_to_smem %s1148_s0, 16, %s858_s28, [#allocation3] }
   0x9   :  { %s750_s10 = scalar_lea.vmem %s14_s9, 16  ;;  %p755_p4 = scmp.lt.s32.totalorder %s14_s9, %s14_s9 }
   0xa   :  { %p751_p3 = scmp.ne.s32.totalorder %s14_s9, %s750_s10  ;;  %p756_p5 = scmp.lt.s32.totalorder %s750_s10, %s750_s10 }
   0xc   :  { %p757_p6 = por %p756_p5, %p755_p4 }
   0xe   :  { %p758_p7 = pnand %p757_p6, %p751_p3 }
  0x10   :  { %761 = shalt.err (!%p758_p7)  }
  0x11   :  { %s859_s11 = smov [#allocation5]  }
  0x12   :  { %16 = dma.vmem_to_smem %s14_s9, 16, %s859_s11, [#allocation3] }
  0x13   :  { %850 = dma.done.wait [#allocation3], 32 }
  0x14   :  { %851 = vsyncadd [#allocation3], 4294967264 }
  0x15   :  { %18 = sfence }
  0x16   :  { %19 = vsyncpa [#allocation7], 0 }
  0x17   :  { %20 = vsyncpa [#allocation10], 0 }
  0x18   :  { %21 = vsyncpa [#allocation8], 0  ;;  %s860_s0 = smov [#allocation9]   ;;  %s861_s13 = smov [#allocation6]  }
  0x19   :  { %s39_s12 = sshll.u32 %s860_s0, 4  ;;  %s27_s1 = sshll.u32 %s861_s13, 4  ;;  %s40_s12 = int_to_ptr.vmem [resolvable:$true] %s39_s12  ;;  %s921_s1 = int_to_ptr.vmem [resolvable:$true] %s27_s1 }
  0x1a   :  { %s762_s16 = scalar_lea.hbm %s1150_s3, 256 }
  0x1b   :  { %p763_p8 = scmp.ne.s32.totalorder %s1150_s3, %s762_s16  ;;  %p766_p9 = scmp.lt.u32.totalorder %s762_s16, %s1150_s3 }
  0x1d   :  { %p768_p10 = pnand %p766_p9, %p763_p8 }
  0x1f   :  { %771 = shalt.err (!%p768_p10)
}
  0x20   :  { %s772_s21 = scalar_lea.vmem %s40_s12, 256  ;;  %p777_p12 = scmp.lt.s32.totalorder %s40_s12, %s40_s12 }
  0x21   :  { %p773_p11 = scmp.ne.s32.totalorder %s40_s12, %s772_s21  ;;  %p778_p13 = scmp.lt.s32.totalorder %s772_s21, %s772_s21 }
  0x23   :  { %p779_p0 = por %p778_p13, %p777_p12 }
  0x25   :  { %p780_p1 = pnand %p779_p0, %p773_p11 }
  0x27   :  { %783 = shalt.err (!%p780_p1)
}
  0x28   :  { %s862_s22 = smov 128   ;;  %s863_s23 = smov 8  }
  0x29   :  { %45 = dma.hbm_to_vmem [thread:$0]  %s1150_s3, 256, %s40_s12, [#allocation10], %s862_s22, %s862_s22, %s863_s23  }
  0x2a   :  { %s784_s28 = scalar_lea.hbm %s1149_s2, 1024 }
  0x2b   :  { %p785_p2 = scmp.ne.s32.totalorder %s1149_s2, %s784_s28  ;;  %p788_p3 = scmp.lt.u32.totalorder %s784_s28, %s1149_s2 }
  0x2d   :  { %p790_p4 = pnand %p788_p3, %p785_p2 }
  0x2f   :  { %793 = shalt.err (!%p790_p4)
}
  0x30   :  { %s794_s9 = scalar_lea.vmem %s921_s1, 1024  ;;  %p799_p6 = scmp.lt.s32.totalorder %s921_s1, %s921_s1 }
  0x31   :  { %p795_p5 = scmp.ne.s32.totalorder %s921_s1, %s794_s9  ;;  %p800_p7 = scmp.lt.s32.totalorder %s794_s9, %s794_s9 }
  0x33   :  { %p801_p8 = por %p800_p7, %p799_p6 }
  0x35   :  { %p802_p9 = pnand %p801_p8, %p795_p5 }
  0x37   :  { %805 = shalt.err (!%p802_p9)
}
  0x38   :  { %33 = dma.hbm_to_vmem [thread:$0]  %s1149_s2, 1024, %s921_s1, [#allocation7], %s862_s22, %s862_s22, %s863_s23  }
  0x39   :  { %s864_s11 = smov [#allocation11]   ;;  %s806_s14 = scalar_lea.hbm %s1151_s4, 2048 }
  0x3a   :  { %s51_s0 = sshll.u32 %s864_s11, 4  ;;  %p807_p10 = scmp.ne.s32.totalorder %s1151_s4, %s806_s14  ;;  %s52_s0 = int_to_ptr.vmem [resolvable:$true] %s51_s0 }
  0x3b   :  { %p810_p11 = scmp.lt.u32.totalorder %s806_s14, %s1151_s4 }
  0x3d   :  { %p812_p12 = pnand %p810_p11, %p807_p10 }
  0x3f   :  { %815 = shalt.err (!%p812_p12)
}
  0x40   :  { %s816_s19 = scalar_lea.vmem %s52_s0, 2048  ;;  %p821_p0 = scmp.lt.s32.totalorder %s52_s0, %s52_s0 }
  0x41   :  { %p817_p13 = scmp.ne.s32.totalorder %s52_s0, %s816_s19  ;;  %p822_p1 = scmp.lt.s32.totalorder %s816_s19, %s816_s19 }
  0x43   :  { %p823_p2 = por %p822_p1, %p821_p0 }
  0x45   :  { %p824_p3 = pnand %p823_p2, %p817_p13 }
  0x47   :  { %827 = shalt.err (!%p824_p3)
}
  0x48   :  { %57 = dma.hbm_to_vmem [thread:$0]  %s1151_s4, 2048, %s52_s0, [#allocation10], %s862_s22, %s862_s22, %s863_s23  }
  0x49   :  { %852 = dma.done.wait [#allocation7], 1024  }
  0x4a   :  { %853 = vsyncadd [#allocation7], 4294966272 }
  0x4b   :  { %854 = dma.done.wait [#allocation10], 2304  }
  0x4c   :  { %855 = vsyncadd [#allocation10], 4294964992  ;;  %v865_v0 = vmov 49   ;;  %s973_s20 = sld [smem:[#allocation5]]  ;;  %s975_s21 = sld [smem:[#allocation5 + $0x1]]  ;;  %v866_v1 = vmov 0.0|0.0  }
  0x4d   :  { %736 = vset.pattern.permute.xlu0 %v865_v0  ;;  %s977_s24 = sld [smem:[#allocation5 + $0x2]]  ;;  %s979_s25 = sld [smem:[#allocation5 + $0x3]]  ;;  %699 = vmatprep.subr.bf16.mxu0 %v866_v1  ;;  %v417_v2 = vld [vmem:[#allocation11] sm:$0xff]  ;;  %v418_v3 = vld [vmem:[#allocation11 + $0x8] sm:$0xff]  ;;  %v419_v5 = vld [vmem:[#allocation11 + $0x10] sm:$0xff]  ;;  %vm363_vm0 = vcmask 1040384  }
  0x4e   :  { %s981_s26 = sld [smem:[#allocation5 + $0x4]]  ;;  %s983_s27 = sld [smem:[#allocation5 + $0x5]]  ;;  %v700_v4 = vpack.c.bf16 %v418_v3, %v417_v2  ;;  %v420_v8 = vld [vmem:[#allocation11 + $0x18] sm:$0xff]  ;;  %v421_v9 = vld [vmem:[#allocation11 + $0x20] sm:$0xff]  ;;  %v422_v11 = vld [vmem:[#allocation11 + $0x28] sm:$0xff]  ;;  %vm365_vm1 = vcmask 1041408  }
  0x4f   :  { %s598_s28 = sld [smem:[#allocation5 + $0x6]]  ;;  %s599_s4 = sld [smem:[#allocation5 + $0x7]]  ;;  %v703_v10 = vpack.c.bf16 %v420_v8, %v419_v5  ;;  %v706_v12 = vpack.c.bf16 %v422_v11, %v421_v9  ;;  %v423_v14 = vld [vmem:[#allocation11 + $0x30] sm:$0xff]  ;;  %v424_v15 = vld [vmem:[#allocation11 + $0x38] sm:$0xff]  ;;  %v425_v23 = vld [vmem:[#allocation11 + $0x40] sm:$0xff]  ;;  %vm367_vm2 = vcmask 1042432  }
  0x50   :  { %s986_s22 = sld [smem:[#allocation5 + $0x8]]  ;;  %s988_s23 = sld [smem:[#allocation5 + $0x9]]  ;;  %701 = vmatpush3.bf16.msra.mxu0 %v700_v4  ;;  %v709_v21 = vpack.c.bf16 %v424_v15, %v423_v14  ;;  %v426_v24 = vld [vmem:[#allocation11 + $0x48] sm:$0xff]  ;;  %v427_v36 = vld [vmem:[#allocation11 + $0x50] sm:$0xff]  ;;  %v428_v37 = vld [vmem:[#allocation11 + $0x58] sm:$0xff]  ;;  %vm369_vm3 = vcmask 1043456  }
  0x51   :  { %s990_s29 = sld [smem:[#allocation5 + $0xa]]  ;;  %s992_s30 = sld [smem:[#allocation5 + $0xb]]  ;;  %702 = vmatprep.subr.bf16.mxu0 %v866_v1  ;;  %v712_v33 = vpack.c.bf16 %v426_v24, %v425_v23  ;;  %v715_v44 = vpack.c.bf16 %v428_v37, %v427_v36  ;;  %v429_v47 = vld [vmem:[#allocation11 + $0x60] sm:$0xff]  ;;  %v430_v48 = vld [vmem:[#allocation11 + $0x68] sm:$0xff]  ;;  %vm371_vm4 = vcmask 1044480   ;;  %vm373_vm5 = vcmask 1045504  }
  0x52   :  { %s605_s9 = sld [smem:[#allocation5 + $0xc]]  ;;  %s995_s3 = sld [smem:[#allocation5 + $0xd]]  ;;  %v718_v56 = vpack.c.bf16 %v430_v48, %v429_v47  ;;  %vm375_vm6 = vcmask 1046528   ;;  %vm868_vm7 = vmmov 0  }
  0x53   :  { %s997_s10 = sld [smem:[#allocation5 + $0xe]]  ;;  %s999_s11 = sld [smem:[#allocation5 + $0xf]] }
  0x54   :  { %s1001_s0 = sld [smem:[#allocation5 + $0x10]]  ;;  %s1003_s12 = sld [smem:[#allocation5 + $0x11]]  ;;  %704 = vmatpush3.bf16.msra.mxu0 %v703_v10 }
  0x55   :  { %s110_s7 = scalar_lea.vmem [#allocation9], %s598_s28  ;;  %s115_s8 = scalar_lea.vmem [#allocation9], %s599_s4  ;;  %705 = vmatprep.subr.bf16.mxu0 %v866_v1 }
  0x56   :  { %v111_v6 = vld [vmem:[%s110_s7] sm:$0x1]  ;;  %s1005_s13 = sld [smem:[#allocation5 + $0x12]]  ;;  %s1007_s14 = sld [smem:[#allocation5 + $0x13]] }
  0x57   :  { %v116_v7 = vld [vmem:[%s115_s8] sm:$0x1]  ;;  %s1009_s15 = sld [smem:[#allocation5 + $0x14]]  ;;  %s1011_s16 = sld [smem:[#allocation5 + $0x15]] }
  0x58   :  { %v117_v13 = vadd.f32 %v116_v7, %v111_v6  ;;  %s1013_s17 = sld [smem:[#allocation5 + $0x16]]  ;;  %s76_s18 = scalar_lea.vmem [#allocation9], %s973_s20  ;;  %707 = vmatpush3.bf16.msra.mxu0 %v706_v12 }
  0x59   :  { %v77_v16 = vld [vmem:[%s76_s18] sm:$0x1]  ;;  %s120_s19 = scalar_lea.vmem [#allocation9], %s986_s22  ;;  %s81_s2 = scalar_lea.vmem [#allocation9], %s975_s21  ;;  %708 = vmatprep.subr.bf16.mxu0 %v866_v1 }
  0x5a   :  { %v121_v17 = vld [vmem:[%s120_s19] sm:$0x1]  ;;  %s144_s1 = scalar_lea.vmem [#allocation9], %s605_s9  ;;  %s149_s28 = scalar_lea.vmem [#allocation9], %s995_s3 }
  0x5b   :  { %v82_v18 = vld [vmem:[%s81_s2] sm:$0x1]  ;;  %s1020_s4 = sld [smem:[#allocation5 + $0x17]]  ;;  %v122_v22 = vadd.f32 %v121_v17, %v117_v13  ;;  %s125_s20 = scalar_lea.vmem [#allocation9], %s988_s23 }
  0x5c   :  { %v145_v19 = vld [vmem:[%s144_s1] sm:$0x1]  ;;  %s178_s21 = scalar_lea.vmem [#allocation9], %s1005_s13  ;;  %v83_v28 = vadd.f32 %v82_v18, %v77_v16  ;;  %s154_s22 = scalar_lea.vmem [#allocation9], %s997_s10  ;;  %710 = vmatpush3.bf16.msra.mxu0 %v709_v21 }
  0x5d   :  { %v150_v20 = vld [vmem:[%s149_s28] sm:$0x1]  ;;  %s183_s7 = scalar_lea.vmem [#allocation9], %s1007_s14  ;;  %s86_s8 = scalar_lea.vmem [#allocation9], %s977_s24  ;;  %711 = vmatprep.subr.bf16.mxu0 %v866_v1 }
  0x5e   :  { %v126_v25 = vld [vmem:[%s125_s20] sm:$0x1]  ;;  %v151_v26 = vadd.f32 %v150_v20, %v145_v19  ;;  %s130_s9 = scalar_lea.vmem [#allocation9], %s990_s29  ;;  %s1029_s23 = sld [smem:[#allocation5 + $0x18]] }
  0x5f   :  { %v179_v27 = vld [vmem:[%s178_s21] sm:$0x1]  ;;  %v127_v34 = vadd.f32 %v126_v25, %v122_v22  ;;  %s1031_s3 = sld [smem:[#allocation5 + $0x19]]  ;;  %s91_s10 = scalar_lea.vmem [#allocation9], %s979_s25 }
  0x60   :  { %v155_v29 = vld [vmem:[%s154_s22] sm:$0x1]  ;;  %s188_s24 = scalar_lea.vmem [#allocation9], %s1009_s15  ;;  %s1036_s29 = sld [smem:[#allocation5 + $0x1a]]  ;;  %713 = vmatpush3.bf16.msra.mxu0 %v712_v33 }
  0x61   :  { %v184_v30 = vld [vmem:[%s183_s7] sm:$0x1]  ;;  %v156_v39 = vadd.f32 %v155_v29, %v151_v26  ;;  %s1038_s13 = sld [smem:[#allocation5 + $0x1b]]  ;;  %s159_s14 = scalar_lea.vmem [#allocation9], %s999_s11  ;;  %714 = vmatprep.subr.bf16.mxu0 %v866_v1 }
  0x62   :  { %v87_v31 = vld [vmem:[%s86_s8] sm:$0x1]  ;;  %v185_v35 = vadd.f32 %v184_v30, %v179_v27  ;;  %s1041_s18 = sld [smem:[#allocation5 + $0x1c]]  ;;  %s1043_s19 = sld [smem:[#allocation5 + $0x1d]] }
  0x63   :  { %v131_v32 = vld [vmem:[%s130_s9] sm:$0x1]  ;;  %v88_v41 = vadd.f32 %v87_v31, %v83_v28  ;;  %s135_s2 = scalar_lea.vmem [#allocation9], %s992_s30  ;;  %s1046_s1 = sld [smem:[#allocation5 + $0x1e]] }
  0x64   :  { %v92_v38 = vld [vmem:[%s91_s10] sm:$0x1]  ;;  %s1048_s25 = sld [smem:[#allocation5 + $0x1f]]  ;;  %v132_v45 = vadd.f32 %v131_v32, %v127_v34  ;;  %s1050_s11 = sld [smem:[#allocation5 + $0x20]]  ;;  %716 = vmatpush3.bf16.msra.mxu0 %v715_v44 }
  0x65   :  { %v189_v40 = vld [vmem:[%s188_s24] sm:$0x1]  ;;  %s1052_s15 = sld [smem:[#allocation5 + $0x21]]  ;;  %s193_s30 = scalar_lea.vmem [#allocation9], %s1011_s16  ;;  %v93_v51 = vadd.f32 %v92_v38, %v88_v41  ;;  %717 = vmatprep.subr.bf16.mxu0 %v866_v1 }
  0x66   :  { %v160_v42 = vld [vmem:[%s159_s14] sm:$0x1]  ;;  %v190_v46 = vadd.f32 %v189_v40, %v185_v35  ;;  %s1056_s28 = sld [smem:[#allocation5 + $0x22]]  ;;  %s1058_s20 = sld [smem:[#allocation5 + $0x23]] }
  0x67   :  { %v136_v43 = vld [vmem:[%s135_s2] sm:$0x1]  ;;  %v161_v49 = vadd.f32 %v160_v42, %v156_v39  ;;  %s96_s21 = scalar_lea.vmem [#allocation9], %s981_s26  ;;  %s164_s22 = scalar_lea.vmem [#allocation9], %s1001_s0 }
  0x68   :  { %v194_v50 = vld [vmem:[%s193_s30] sm:$0x1]  ;;  %s212_s7 = scalar_lea.vmem [#allocation9], %s1029_s23  ;;  %s217_s8 = scalar_lea.vmem [#allocation9], %s1031_s3  ;;  %v1064_v57 = vadd.f32 %v136_v43, %v132_v45  ;;  %719 = vmatpush3.bf16.msra.mxu0 %v718_v56 }
  0x69   :  { %v97_v52 = vld [vmem:[%s96_s21] sm:$0x1]  ;;  %s169_s16 = scalar_lea.vmem [#allocation9], %s1003_s12  ;;  %v195_v59 = vadd.f32 %v194_v50, %v190_v46  ;;  %s222_s26 = scalar_lea.vmem [#allocation9], %s1036_s29  ;;  %720 = vmatprep.subr.bf16.mxu0 %v866_v1 }
  0x6a   :  { %v165_v53 = vld [vmem:[%s164_s22] sm:$0x1]  ;;  %s101_s0 = scalar_lea.vmem [#allocation9], %s983_s27  ;;  %s198_s9 = scalar_lea.vmem [#allocation9], %s1013_s17  ;;  %v98_v3 = vadd.f32 %v97_v52, %v93_v51  ;;  %v378_v13 = vrot.slane %v1064_v57, 7 }
  0x6b   :  { %v213_v54 = vld [vmem:[%s212_s7] sm:$0x1]  ;;  %v166_v63 = vadd.f32 %v165_v53, %v161_v49  ;;  %s227_s23 = scalar_lea.vmem [#allocation9], %s1038_s13  ;;  %s246_s12 = scalar_lea.vmem [#allocation9], %s1046_s1 }
  0x6c   :  { %v218_v55 = vld [vmem:[%s217_s8] sm:$0x1]  ;;  %s251_s3 = scalar_lea.vmem [#allocation9], %s1048_s25  ;;  %s232_s10 = scalar_lea.vmem [#allocation9], %s1041_s18 }
  0x6d   :  { %v170_v58 = vld [vmem:[%s169_s16] sm:$0x1]  ;;  %v219_v60 = vadd.f32 %v218_v55, %v213_v54  ;;  %s256_s24 = scalar_lea.vmem [#allocation9], %s1050_s11  ;;  %s261_s27 = scalar_lea.vmem [#allocation9], %s1052_s15 }
  0x6e   :  { %v223_v61 = vld [vmem:[%s222_s26] sm:$0x1]  ;;  %s1077_s17 = sld [smem:[#allocation5 + $0x24]]  ;;  %v171_v14 = vadd.f32 %v170_v58, %v166_v63  ;;  %s203_s29 = scalar_lea.vmem [#allocation9], %s1020_s4 }
  0x6f   :  { %v102_v62 = vld [vmem:[%s101_s0] sm:$0x1]  ;;  %v224_v4 = vadd.f32 %v223_v61, %v219_v60  ;;  %s1082_s13 = sld [smem:[#allocation5 + $0x25]]  ;;  %s1084_s14 = sld [smem:[#allocation5 + $0x26]] }
  0x70   :  { %v199_v0 = vld [vmem:[%s198_s9] sm:$0x1]  ;;  %v103_v17 = vadd.f32 %v102_v62, %v98_v3  ;;  %s237_s18 = scalar_lea.vmem [#allocation9], %s1043_s19  ;;  %s1087_s2 = sld [smem:[#allocation5 + $0x27]]  ;;  %v381_v23 = vrot.slane %v171_v14, 6 }
  0x71   :  { %v228_v2 = vld [vmem:[%s227_s23] sm:$0x1]  ;;  %v200_v10 = vadd.f32 %v199_v0, %v195_v59  ;;  %s1089_s1 = sld [smem:[#allocation5 + $0x28]]  ;;  %s266_s25 = scalar_lea.vmem [#allocation9], %s1056_s28 }
  0x72   :  { %v247_v5 = vld [vmem:[%s246_s12] sm:$0x1]  ;;  %v229_v11 = vadd.f32 %v228_v2, %v224_v4  ;;  %s1092_s4 = sld [smem:[#allocation5 + $0x29]]  ;;  %s1094_s11 = sld [smem:[#allocation5 + $0x2a]]  ;;  %v398_v25 = vsel %vm363_vm0, %v103_v17, %v378_v13 }
  0x73   :  { %v252_v6 = vld [vmem:[%s251_s3] sm:$0x1]  ;;  %s1096_s15 = sld [smem:[#allocation5 + $0x2b]]  ;;  %s1098_s19 = sld [smem:[#allocation5 + $0x2c]]  ;;  %v399_v33 = vsel %vm365_vm1, %v398_v25, %v381_v23  ;;  %v869_v25 = vmov 0.0  }
  0x74   :  { %v233_v7 = vld [vmem:[%s232_s10] sm:$0x1]  ;;  %v253_v8 = vadd.f32 %v252_v6, %v247_v5  ;;  %s1100_s30 = sld [smem:[#allocation5 + $0x2d]]  ;;  %s1102_s21 = sld [smem:[#allocation5 + $0x2e]]  ;;  %696 = vmatprep.mubr.msk.f32.mxu0 %vm868_vm7, %v869_v25 }
  0x75   :  { %v257_v9 = vld [vmem:[%s256_s24] sm:$0x1]  ;;  %v234_v18 = vadd.f32 %v233_v7, %v229_v11  ;;  %s1104_s28 = sld [smem:[#allocation5 + $0x2f]]  ;;  %s271_s22 = scalar_lea.vmem [#allocation9], %s1058_s20 }
  0x76   :  { %v262_v12 = vld [vmem:[%s261_s27] sm:$0x1]  ;;  %v258_v16 = vadd.f32 %v257_v9, %v253_v8  ;;  %s280_s7 = scalar_lea.vmem [#allocation9], %s1077_s17  ;;  %s285_s8 = scalar_lea.vmem [#allocation9], %s1082_s13 }
  0x77   :  { %v204_v15 = vld [vmem:[%s203_s29] sm:$0x1]  ;;  %s290_s16 = scalar_lea.vmem [#allocation9], %s1084_s14  ;;  %s295_s20 = scalar_lea.vmem [#allocation9], %s1087_s2 }
  0x78   :  { %v238_v19 = vld [vmem:[%s237_s18] sm:$0x1]  ;;  %v263_v20 = vadd.f32 %v262_v12, %v258_v16  ;;  %v205_v21 = vadd.f32 %v204_v15, %v200_v10  ;;  %s314_s26 = scalar_lea.vmem [#allocation9], %s1094_s11  ;;  %s300_s23 = scalar_lea.vmem [#allocation9], %s1089_s1 }
  0x79   :  { %v267_v1 = vld [vmem:[%s266_s25] sm:$0x1]  ;;  %v239_v22 = vadd.f32 %v238_v19, %v234_v18  ;;  %s319_s0 = scalar_lea.vmem [#allocation9], %s1096_s15  ;;  %s324_s9 = scalar_lea.vmem [#allocation9], %s1098_s19 }
  0x7a   :  { %v268_v24 = vadd.f32 %v267_v1, %v263_v20  ;;  %v272_v26 = vld [vmem:[%s271_s22] sm:$0x1]  ;;  %v384_v30 = vrot.slane %v205_v21, 5  ;;  %s329_s12 = scalar_lea.vmem [#allocation9], %s1100_s30  ;;  %s305_s3 = scalar_lea.vmem [#allocation9], %s1092_s4  ;;  %v432_v21 = vld [vmem:[#allocation11 + $0x78] sm:$0xff] }
  0x7b   :  { %v281_v27 = vld [vmem:[%s280_s7] sm:$0x1]  ;;  %v387_v32 = vrot.slane %v239_v22, 4  ;;  %s334_s10 = scalar_lea.vmem [#allocation9], %s1102_s21  ;;  %s597_s24 = sld [smem:[#allocation4 + $0x1]] }
  0x7c   :  { %v286_v28 = vld [vmem:[%s285_s8] sm:$0x1]  ;;  %v273_v34 = vadd.f32 %v272_v26, %v268_v24  ;;  %v400_v42 = vsel %vm367_vm2, %v399_v33, %v384_v30  ;;  %s604_s27 = sld [smem:[#allocation4 + $0x2]]  ;;  %s339_s17 = scalar_lea.vmem [#allocation9], %s1104_s28  ;;  %v867_v24 = vmov 0   ;;  %v510_v30 = vlaneseq }
  0x7d   :  { %v291_v29 = vld [vmem:[%s290_s16] sm:$0x1]  ;;  %v287_v31 = vadd.f32 %v286_v28, %v281_v27  ;;  %v401_v50 = vsel %vm369_vm3, %v400_v42, %v387_v32  ;;  %s611_s29 = sld [smem:[#allocation4 + $0x3]]  ;;  %s618_s13 = sld [smem:[#allocation4 + $0x4]] }
  0x7e   :  { %v296_v35 = vld [vmem:[%s295_s20] sm:$0x1]  ;;  %v390_v47 = vrot.slane %v273_v34, 3  ;;  %s625_s14 = sld [smem:[#allocation4 + $0x5]]  ;;  %s632_s18 = sld [smem:[#allocation4 + $0x6]] }
  0x7f   :  { %v315_v36 = vld [vmem:[%s314_s26] sm:$0x1]  ;;  %v292_v37 = vadd.f32 %v291_v29, %v287_v31  ;;  %s639_s2 = sld [smem:[#allocation4 + $0x7]]  ;;  %s71_s1 = sld [smem:[#allocation4]]  ;;  %v511_v31 = vand.u32 127, %v510_v30 }
  0x80   :  { %v320_v38 = vld [vmem:[%s319_s0] sm:$0x1]  ;;  %v402_v55 = vsel %vm371_vm4, %v401_v50, %v390_v47  ;;  %s870_s8 = smov [#allocation12]  }
  0x81   :  { %v325_v39 = vld [vmem:[%s324_s9] sm:$0x1]  ;;  %v321_v41 = vadd.f32 %v320_v38, %v315_v36  ;;  %v297_v43 = vadd.f32 %v296_v35, %v292_v37  ;;  %s106_s25 = scalar_lea.vmem [#allocation6], %s597_s24  ;;  %s526_s16 = sshll.u32 %s870_s8, 4  ;;  %vm512_vm8 = vcmp.eq.s32.totalorder %v511_v31, 32  ;;  %s527_s16 = int_to_ptr.vmem [resolvable:$true] %s526_s16 }
  0x82   :  { %v301_v40 = vld [vmem:[%s300_s23] sm:$0x1]  ;;  %s140_s4 = scalar_lea.vmem [#allocation6], %s604_s27  ;;  %s828_s20 = scalar_lea.vmem %s527_s16, 128 }
  0x83   :  { %v330_v44 = vld [vmem:[%s329_s12] sm:$0x1]  ;;  %v326_v46 = vadd.f32 %v325_v39, %v321_v41  ;;  %v302_v48 = vadd.f32 %v301_v40, %v297_v43  ;;  %s174_s11 = scalar_lea.vmem [#allocation6], %s611_s29  ;;  %s208_s15 = scalar_lea.vmem [#allocation6], %s618_s13 }
  0x84   :  { %v306_v45 = vld [vmem:[%s305_s3] sm:$0x1]  ;;  %s242_s19 = scalar_lea.vmem [#allocation6], %s625_s14  ;;  %s276_s30 = scalar_lea.vmem [#allocation6], %s632_s18 }
  0x85   :  { %v335_v49 = vld [vmem:[%s334_s10] sm:$0x1]  ;;  %v331_v51 = vadd.f32 %v330_v44, %v326_v46  ;;  %v307_v52 = vadd.f32 %v306_v45, %v302_v48  ;;  %s310_s21 = scalar_lea.vmem [#allocation6], %s639_s2  ;;  %s72_s28 = scalar_lea.vmem [#allocation6], %s71_s1 }
  0x86   :  { %v340_v53 = vld [vmem:[%s339_s17] sm:$0x1]  ;;  %p829_p4 = scmp.ne.s32.totalorder %s527_s16, %s828_s20  ;;  %p833_p5 = scmp.lt.s32.totalorder %s527_s16, %s527_s16 }
  0x87   :  { %v336_v54 = vadd.f32 %v335_v49, %v331_v51  ;;  %v393_v56 = vrot.slane %v307_v52, 2  ;;  %v107_v62 = vld [vmem:[%s106_s25] sm:$0x1]  ;;  %p834_p6 = scmp.lt.s32.totalorder %s828_s20, %s828_s20 }
  0x88   :  { %v141_v63 = vld [vmem:[%s140_s4] sm:$0x1]  ;;  %v343_v3 = vrot.slane %v107_v62, 7 }
  0x89   :  { %v341_v57 = vadd.f32 %v340_v53, %v336_v54  ;;  %v403_v58 = vsel %vm373_vm5, %v402_v55, %v393_v56  ;;  %v175_v0 = vld [vmem:[%s174_s11] sm:$0x1]  ;;  %v346_v5 = vrot.slane %v141_v63, 6  ;;  %p835_p7 = por %p834_p6, %p833_p5 }
  0x8a   :  { %v209_v2 = vld [vmem:[%s208_s15] sm:$0x1]  ;;  %v349_v7 = vrot.slane %v175_v0, 5 }
  0x8b   :  { %v396_v59 = vrot.slane %v341_v57, 1  ;;  %v243_v4 = vld [vmem:[%s242_s19] sm:$0x1]  ;;  %v352_v9 = vrot.slane %v209_v2, 4  ;;  %p836_p8 = pnand %p835_p7, %p829_p4 }
  0x8c   :  { %v277_v6 = vld [vmem:[%s276_s30] sm:$0x1]  ;;  %v355_v11 = vrot.slane %v243_v4, 3 }
  0x8d   :  { %v404_v60 = vsel %vm375_vm6, %v403_v58, %v396_v59  ;;  %v311_v8 = vld [vmem:[%s310_s21] sm:$0x1]  ;;  %v358_v13 = vrot.slane %v277_v6, 2 }
  0x8e   :  { %v405_v61 = vmax.f32 %v404_v60, 1.0  ;;  %v73_v10 = vld [vmem:[%s72_s28] sm:$0x1]  ;;  %v361_v15 = vrot.slane %v311_v8, 1 }
  0x8f   :  { %v364_v12 = vsel %vm363_vm0, %v73_v10, %v343_v3  ;;  %v431_v1 = vld [vmem:[#allocation11 + $0x70] sm:$0xff] }
  0x90   :  { %738 = vrcp.f32 %v405_v61  ;;  %v366_v14 = vsel %vm365_vm1, %v364_v12, %v346_v5  ;;  %v721_v23 = vpack.c.bf16 %v432_v21, %v431_v1  ;;  %v646_v32 = vld [vmem:[%s1152_s5] ss:$0 sm:$0xff] }
  0x91   :  { %v368_v16 = vsel %vm367_vm2, %v366_v14, %v349_v7 }
  0x92   :  { %v370_v17 = vsel %vm369_vm3, %v368_v16, %v352_v9  ;;  %722 = vmatpush3.bf16.msra.mxu0 %v721_v23 }
  0x93   :  { %v372_v19 = vsel %vm371_vm4, %v370_v17, %v355_v11 }
  0x94   :  { %v374_v20 = vsel %vm373_vm5, %v372_v19, %v358_v13 }
  0x95   :  { %v376_v22 = vsel %vm375_vm6, %v374_v20, %v361_v15 }
  0x9a   :  { %v739_v18 = vpop.eup %738 }
  0x9b   :  { %409 = vperm.xlu0 %736, %v739_v18  }
  0x9f   :  { %737 = vset.pattern.permute.xlu0 %v867_v24 }
 0x11a   :  { %v410_v26 = vpop.permute.xlu0 %409 }
 0x11b   :  { %v412_v27 = vmul.f32 %v410_v26, %v404_v60 }
 0x11d   :  { %v413_v28 = vadd.f32 %v412_v27, %v376_v22 }
 0x11f   :  { %515 = vperm.xlu0 %737, %v413_v28   ;;  %v416_v29 = vmax.f32 %v413_v28, 0.0 }
 0x121   :  { %697 = vmatmul.mubr.f32.vlgmr.msra.gmra.mrb[0].mxu0 %v416_v29 }
 0x19e   :  { %v516_v36 = vpop.permute.xlu0 %515 }
 0x1f4   :  { %v506_v33 = vpop.f32.mrb[0].mxu0 }
 0x1f5   :  { %v507_v34 = vadd.f32 %v646_v32, %v506_v33  ;;  %v698_v35 = vpop.f32.mrb[1].mxu0 }
 0x1f7   :  { %v518_v37 = vsel %vm512_vm8, %v516_v36, %v507_v34 }
 0x1f8   :  { %519 = vst [vmem:[#allocation12] sm:$0xff] %v518_v37 }
 0x1f9   :  { %839 = shalt.err (!%p836_p8)
}
 0x1fa   :  { %s840_s5 = scalar_lea.hbm %s1153_s6, 128 }
 0x1fb   :  { %p841_p9 = scmp.ne.s32.totalorder %s1153_s6, %s840_s5  ;;  %p844_p10 = scmp.lt.u32.totalorder %s840_s5, %s1153_s6 }
 0x1fd   :  { %p846_p11 = pnand %p844_p10, %p841_p9 }
 0x1ff   :  { %849 = shalt.err (!%p846_p11)
}
 0x200   :  { %529 = dma.vmem_to_hbm [thread:$0]  %s527_s16, 128, %s1153_s6, [#allocation8]  }
 0x201   :  { %856 = dma.done.wait [#allocation8], 128  }
 0x202   :  { %857 = vsyncadd [#allocation8], 4294967168 }
 0x203   :  { %533 = vsyncpa [#allocation7], 1 }
 0x204   :  { %534 = vsyncpa [#allocation10], 1 }
 0x205   :  { %535 = vsyncpa [#allocation8], 1 }

</bundles_post_ra>
